<compile_context>
chip_gen: v7x
topology: tpu7x:2x2x1
jax: 0.10.0
libtpu: 0.0.40
codegen_flags: <defaults>
</compile_context>

<pallas_src>
import functools

import jax
import jax.numpy as jnp
import numpy as np
from jax.experimental import pallas as pl
from jax.experimental.pallas import tpu as pltpu


def _round_up(x, m):
    return ((x + m - 1) // m) * m


def _cdiv(a, b):
    return -(-a // b)


# ----------------------------------------------------------------------------
# Pallas kernel (everything transposed: batch lives in the lane dimension)
# ----------------------------------------------------------------------------
def _dmaq_si_weight_kernel(kn,
                           data_ref,      # (S+A, TB)
                           w1_ref,        # (3*K*E, S+A)
                           b1_ref,        # (3*K*E, 1)
                           w2_ref,        # (3*K*N, 3*K*E)  block-diagonal
                           b2_ref,        # (3*K*N, 1)
                           ssum_ref,      # (N, K*N)  constant 0/1 sum matrix
                           out_ref):      # (N, TB)
    x = data_ref[...]

    # Single fused first layer (key | agents | action banks) + ReLU.
    h = jnp.maximum(
        jnp.dot(w1_ref[...], x, preferred_element_type=jnp.float32)
        + b1_ref[...],
        0.0)                                                   # (3KE, TB)

    # Single fused block-diagonal second layer.
    y = (jnp.dot(w2_ref[...], h, preferred_element_type=jnp.float32)
         + b2_ref[...])                                        # (3KN, TB)

    # Sublane-aligned slices (kn and 2*kn are multiples of 8).
    x_key = jnp.abs(y[:kn, :]) + 1e-10          # |key| pre-replicated over agents
    x_agents = jax.nn.sigmoid(y[kn:2 * kn, :])
    x_action = jax.nn.sigmoid(y[2 * kn:, :])
    prod = x_key * x_agents * x_action                          # (KN, TB)

    # Sum over the K kernels with a tiny constant 0/1 matmul (N = TB lane-dense).
    out_ref[...] = jnp.dot(ssum_ref[...], prod,
                           preferred_element_type=jnp.float32
                           ).astype(out_ref.dtype)              # (N, TB)


# ----------------------------------------------------------------------------
# Wrapper
# ----------------------------------------------------------------------------
def dmaq_si_weight(states, actions, fused, *, n_agents, num_kernel,
                   batch_tile=1024):
    """states: (..., state_dim); actions: (..., n_agents, n_actions) or flat."""
    w1_t = fused["w1_t"]
    KE3, SA = w1_t.shape
    KN = num_kernel * n_agents
    KN3 = 3 * KN

    S = SA - actions.reshape(-1).shape[0] // states.reshape(-1, states.shape[-1]).shape[0]
    states = states.reshape(-1, states.shape[-1]).astype(jnp.float32)
    B = states.shape[0]
    actions = actions.reshape(B, -1).astype(jnp.float32)
    data = jnp.concatenate([states, actions], axis=1)           # (B, S+A)
    assert data.shape[1] == SA

    # ---- tile choice: balanced, lane-dense (multiple of 128), >=2 steps when
    # there is enough work so both v7x TensorCores get a share. --------------
    n_tiles = max(1, _cdiv(B, batch_tile))
    if B > 256:
        n_tiles = max(n_tiles, 2)
    if n_tiles > 1 and (n_tiles % 2):
        n_tiles += 1
    TB = _round_up(_cdiv(B, n_tiles), 128)
    Bp = n_tiles * TB

    data_t = data.T                                             # (S+A, B)
    if Bp != B:
        data_t = jnp.pad(data_t, ((0, 0), (0, Bp - B)))

    fixed = lambda shape: pl.BlockSpec(shape, lambda i: (0, 0))

    kernel = functools.partial(_dmaq_si_weight_kernel, KN)

    out_t = pl.pallas_call(
        kernel,
        out_shape=jax.ShapeDtypeStruct((n_agents, Bp), jnp.float32),
        grid=(n_tiles,),
        in_specs=[
            pl.BlockSpec((SA, TB), lambda i: (0, i)),   # data (states|actions)^T
            fixed((KE3, SA)),                           # fused first-layer W^T
            fixed((KE3, 1)),                            # fused first-layer b
            fixed((KN3, KE3)),                          # fused second-layer W^T
            fixed((KN3, 1)),                            # fused second-layer b
            fixed((n_agents, KN)),                      # 0/1 sum-over-kernels
        ],
        out_specs=pl.BlockSpec((n_agents, TB), lambda i: (0, i)),
        compiler_params=pltpu.CompilerParams(
            dimension_semantics=("parallel",),
            vmem_limit_bytes=32 * 1024 * 1024),
    )(data_t, fused["w1_t"], fused["b1_t"], fused["w2_t"], fused["b2_t"],
      fused["ssum_t"])

    return out_t.T[:B]                                          # (B, n_agents)


# ----------------------------------------------------------------------------
# Deterministic parameter init (PyTorch-Linear-style uniform) + fusion
# ----------------------------------------------------------------------------
def init_params(key, state_dim, action_dim, n_agents, num_kernel, embed):
    def linear(k, fan_in, fan_out):
        k1, k2 = jax.random.split(k)
        bound = 1.0 / np.sqrt(fan_in)
        W = jax.random.uniform(k1, (fan_in, fan_out), jnp.float32, -bound, bound)
        b = jax.random.uniform(k2, (fan_out,), jnp.float32, -bound, bound)
        return W, b

    sa_dim = state_dim + action_dim
    keys = jax.random.split(key, num_kernel * 6).reshape(num_kernel, 6, 2)

    per = {"key": [], "agents": [], "action": []}
    for i in range(num_kernel):
        per["key"].append((linear(keys[i, 0], state_dim, embed),
                           linear(keys[i, 1], embed, 1)))
        per["agents"].append((linear(keys[i, 2], state_dim, embed),
                              linear(keys[i, 3], embed, n_agents)))
        per["action"].append((linear(keys[i, 4], sa_dim, embed),
                              linear(keys[i, 5], embed, n_agents)))
    return per


def fuse_params(per, state_dim, action_dim, n_agents, num_kernel):
    """Repack per-head PyTorch-style params into the fused transposed layout.

    Exact (no approximation): zero rows fold the action input into one matmul,
    key (E,1) weights are replicated over agents, second layers are a single
    block-diagonal matrix, and the kernel-sum is a 0/1 matrix.
    """
    N, K, A = n_agents, num_kernel, action_dim

    # ---- first layer: columns ordered [key_0..K-1 | ag_0..K-1 | ac_0..K-1] --
    cols, b1 = [], []
    for bank in ("key", "agents", "action"):
        for (W1, bias1), _ in per[bank]:
            if bank != "action":           # states-only banks: zero action rows
                W1 = jnp.concatenate(
                    [W1, jnp.zeros((A, W1.shape[1]), W1.dtype)], axis=0)
            cols.append(W1)                # (S+A, E)
            b1.append(bias1)
    w1_all = jnp.concatenate(cols, axis=1)            # (S+A, 3KE)
    b1_all = jnp.concatenate(b1, axis=0)              # (3KE,)

    # ---- second layer: block-diag of (E, N) blocks, key pre-replicated -----
    blocks, b2 = [], []
    for _, (W2k, b2k) in per["key"]:
        blocks.append(jnp.tile(W2k, (1, N)))          # (E, N) replicated key
        b2.append(jnp.tile(b2k, (N,)))
    for _, (W2g, b2g) in per["agents"]:
        blocks.append(W2g)
        b2.append(b2g)
    for _, (W2a, b2a) in per["action"]:
        blocks.append(W2a)
        b2.append(b2a)
    w2_all = jax.scipy.linalg.block_diag(*blocks)     # (3KE, 3KN)
    b2_all = jnp.concatenate(b2, axis=0)              # (3KN,)

    # sum over kernels: out[j, b] = sum_k prod[k*N + j, b]
    ssum_t = jnp.tile(jnp.eye(N, dtype=jnp.float32), (1, K))    # (N, KN)

    return dict(w1_t=w1_all.T, b1_t=b1_all[:, None],
                w2_t=w2_all.T, b2_t=b2_all[:, None],
                ssum_t=ssum_t)


# ----------------------------------------------------------------------------
# Pure-JAX reference mirroring the PyTorch forward (per-head path)
# ----------------------------------------------------------------------------
def reference(states, actions, per, n_agents, num_kernel, state_dim):
    states = states.reshape(-1, state_dim)
    actions = actions.reshape(states.shape[0], -1)
    data = jnp.concatenate([states, actions], axis=1)
    heads = []
    for i in range(num_kernel):
        (w1k, b1k), (w2k, b2k) = per["key"][i]
        (w1g, b1g), (w2g, b2g) = per["agents"][i]
        (w1a, b1a), (w2a, b2a) = per["action"][i]
        key = jnp.maximum(states @ w1k + b1k, 0.0) @ w2k + b2k            # (B, 1)
        ag = jnp.maximum(states @ w1g + b1g, 0.0) @ w2g + b2g             # (B, N)
        ac = jnp.maximum(data @ w1a + b1a, 0.0) @ w2a + b2a               # (B, N)
        x_key = jnp.tile(jnp.abs(key), (1, n_agents)) + 1e-10
        heads.append(x_key * jax.nn.sigmoid(ag) * jax.nn.sigmoid(ac))
    return jnp.sum(jnp.stack(heads, axis=1), axis=1)


# ----------------------------------------------------------------------------
if __name__ == "__main__":
    n_agents = 4
    n_actions = 5
    state_dim = 32
    num_kernel = 4
    adv_hypernet_embed = 64
    batch, seq = 2, 8                       # B = 16 flattened rows

    action_dim = n_agents * n_actions

    root = jax.random.PRNGKey(0)
    k_params, k_states, k_actions = jax.random.split(root, 3)

    per_kernel = init_params(k_params, state_dim, action_dim,
                             n_agents, num_kernel, adv_hypernet_embed)
    fused = fuse_params(per_kernel, state_dim, action_dim,
                        n_agents, num_kernel)

    states = jax.random.normal(k_states, (batch, seq, state_dim), jnp.float32)
    actions = jax.random.uniform(k_actions, (batch, seq, n_agents, n_actions),
                                 jnp.float32)

    out = dmaq_si_weight(states, actions, fused,
                         n_agents=n_agents, num_kernel=num_kernel,
                         batch_tile=1024)
    out = jax.block_until_ready(out)

    ref = reference(states, actions, per_kernel, n_agents, num_kernel, state_dim)
    np.testing.assert_allclose(np.asarray(out), np.asarray(ref),
                               rtol=1e-5, atol=1e-5)
    print("KERNEL_OK")
</pallas_src>

<mosaic_0001>
module attributes {stable_mosaic.version = 11 : i64} {
  func.func @_dmaq_si_weight_kernel(%arg0: i32, %arg1: memref<52x128xf32, #tpu.memory_space<vmem>>, %arg2: memref<768x52xf32, #tpu.memory_space<vmem>>, %arg3: memref<768x1xf32, #tpu.memory_space<vmem>>, %arg4: memref<48x768xf32, #tpu.memory_space<vmem>>, %arg5: memref<48x1xf32, #tpu.memory_space<vmem>>, %arg6: memref<4x16xf32, #tpu.memory_space<vmem>>, %arg7: memref<4x128xf32, #tpu.memory_space<vmem>>) attributes {dimension_semantics = [#tpu.dimension_semantics<parallel>], iteration_bounds = array<i64: 1>, scalar_prefetch = 0 : i64, scratch_operands = 0 : i64, tpu.core_type = #tpu.core_type<tc>, window_params = [{transform_indices = @transform_0, window_bounds = array<i64: 52, 128>}, {pipeline_mode = #tpu.pipeline_mode<synchronous>, transform_indices = @transform_1, window_bounds = array<i64: 768, 52>}, {pipeline_mode = #tpu.pipeline_mode<synchronous>, transform_indices = @transform_2, window_bounds = array<i64: 768, 1>}, {pipeline_mode = #tpu.pipeline_mode<synchronous>, transform_indices = @transform_3, window_bounds = array<i64: 48, 768>}, {pipeline_mode = #tpu.pipeline_mode<synchronous>, transform_indices = @transform_4, window_bounds = array<i64: 48, 1>}, {pipeline_mode = #tpu.pipeline_mode<synchronous>, transform_indices = @transform_5, window_bounds = array<i64: 4, 16>}, {transform_indices = @transform_6, window_bounds = array<i64: 4, 128>}]} {
    %c0 = arith.constant 0 : index
    %c0_0 = arith.constant 0 : index
    %0 = vector.load %arg1[%c0, %c0_0] : memref<52x128xf32, #tpu.memory_space<vmem>>, vector<52x128xf32>
    %c0_1 = arith.constant 0 : index
    %c0_2 = arith.constant 0 : index
    %1 = vector.load %arg2[%c0_1, %c0_2] : memref<768x52xf32, #tpu.memory_space<vmem>>, vector<768x52xf32>
    %cst = arith.constant dense<0.000000e+00> : vector<768x128xf32>
    %2 = tpu.matmul %1, %0, %cst {dimension_numbers = #tpu.dot_dimension_numbers<[1], [0], [0], [1], [0, 0, 1, 1], [], []>} : vector<768x52xf32>, vector<52x128xf32>, vector<768x128xf32> -> vector<768x128xf32>
    %c0_3 = arith.constant 0 : index
    %c0_4 = arith.constant 0 : index
    %3 = vector.load %arg3[%c0_3, %c0_4] : memref<768x1xf32, #tpu.memory_space<vmem>>, vector<768x1xf32>
    %4 = vector.broadcast %3 : vector<768x1xf32> to vector<768x128xf32>
    %5 = arith.addf %2, %4 : vector<768x128xf32>
    %cst_5 = arith.constant 0.000000e+00 : f32
    %6 = vector.broadcast %cst_5 : f32 to vector<768x128xf32>
    %7 = arith.maximumf %5, %6 : vector<768x128xf32>
    %c0_6 = arith.constant 0 : index
    %c0_7 = arith.constant 0 : index
    %8 = vector.load %arg4[%c0_6, %c0_7] : memref<48x768xf32, #tpu.memory_space<vmem>>, vector<48x768xf32>
    %cst_8 = arith.constant dense<0.000000e+00> : vector<48x128xf32>
    %9 = tpu.matmul %8, %7, %cst_8 {dimension_numbers = #tpu.dot_dimension_numbers<[1], [0], [0], [1], [0, 0, 1, 1], [], []>} : vector<48x768xf32>, vector<768x128xf32>, vector<48x128xf32> -> vector<48x128xf32>
    %c0_9 = arith.constant 0 : index
    %c0_10 = arith.constant 0 : index
    %10 = vector.load %arg5[%c0_9, %c0_10] : memref<48x1xf32, #tpu.memory_space<vmem>>, vector<48x1xf32>
    %11 = vector.broadcast %10 : vector<48x1xf32> to vector<48x128xf32>
    %12 = arith.addf %9, %11 : vector<48x128xf32>
    %13 = vector.extract_strided_slice %12 {offsets = [0, 0], sizes = [16, 128], strides = [1, 1]} : vector<48x128xf32> to vector<16x128xf32>
    %14 = math.absf %13 : vector<16x128xf32>
    %cst_11 = arith.constant 1.000000e-10 : f32
    %15 = vector.broadcast %cst_11 : f32 to vector<16x128xf32>
    %16 = arith.addf %14, %15 : vector<16x128xf32>
    %17 = vector.extract_strided_slice %12 {offsets = [16, 0], sizes = [16, 128], strides = [1, 1]} : vector<48x128xf32> to vector<16x128xf32>
    %18 = arith.negf %17 : vector<16x128xf32>
    %19 = math.exp %18 : vector<16x128xf32>
    %cst_12 = arith.constant 1.000000e+00 : f32
    %20 = vector.broadcast %cst_12 : f32 to vector<16x128xf32>
    %21 = arith.addf %20, %19 : vector<16x128xf32>
    %22 = arith.divf %20, %21 : vector<16x128xf32>
    %23 = vector.extract_strided_slice %12 {offsets = [32, 0], sizes = [16, 128], strides = [1, 1]} : vector<48x128xf32> to vector<16x128xf32>
    %24 = arith.negf %23 : vector<16x128xf32>
    %25 = math.exp %24 : vector<16x128xf32>
    %cst_13 = arith.constant 1.000000e+00 : f32
    %26 = vector.broadcast %cst_13 : f32 to vector<16x128xf32>
    %27 = arith.addf %26, %25 : vector<16x128xf32>
    %28 = arith.divf %26, %27 : vector<16x128xf32>
    %29 = arith.mulf %16, %22 : vector<16x128xf32>
    %30 = arith.mulf %29, %28 : vector<16x128xf32>
    %c0_14 = arith.constant 0 : index
    %c0_15 = arith.constant 0 : index
    %31 = vector.load %arg6[%c0_14, %c0_15] : memref<4x16xf32, #tpu.memory_space<vmem>>, vector<4x16xf32>
    %cst_16 = arith.constant dense<0.000000e+00> : vector<4x128xf32>
    %32 = tpu.matmul %31, %30, %cst_16 {dimension_numbers = #tpu.dot_dimension_numbers<[1], [0], [0], [1], [0, 0, 1, 1], [], []>} : vector<4x16xf32>, vector<16x128xf32>, vector<4x128xf32> -> vector<4x128xf32>
    %c0_17 = arith.constant 0 : index
    %c0_18 = arith.constant 0 : index
    %33 = vector.load %arg7[%c0_17, %c0_18] : memref<4x128xf32, #tpu.memory_space<vmem>>, vector<4x128xf32>
    tpu.vector_store %arg7[%c0_17, %c0_18], %32 {strides = array<i32>} : memref<4x128xf32, #tpu.memory_space<vmem>>, vector<4x128xf32>,
    return
  }
  func.func @transform_0(%arg0: i32) -> (i32, i32) {
    %c0_i32 = arith.constant 0 : i32
    %c0_i32_0 = arith.constant 0 : i32
    return %c0_i32, %arg0 : i32, i32
  }
  func.func @transform_1(%arg0: i32) -> (i32, i32) {
    %c0_i32 = arith.constant 0 : i32
    %c0_i32_0 = arith.constant 0 : i32
    %c0_i32_1 = arith.constant 0 : i32
    return %c0_i32, %c0_i32_0 : i32, i32
  }
  func.func @transform_2(%arg0: i32) -> (i32, i32) {
    %c0_i32 = arith.constant 0 : i32
    %c0_i32_0 = arith.constant 0 : i32
    %c0_i32_1 = arith.constant 0 : i32
    return %c0_i32, %c0_i32_0 : i32, i32
  }
  func.func @transform_3(%arg0: i32) -> (i32, i32) {
    %c0_i32 = arith.constant 0 : i32
    %c0_i32_0 = arith.constant 0 : i32
    %c0_i32_1 = arith.constant 0 : i32
    return %c0_i32, %c0_i32_0 : i32, i32
  }
  func.func @transform_4(%arg0: i32) -> (i32, i32) {
    %c0_i32 = arith.constant 0 : i32
    %c0_i32_0 = arith.constant 0 : i32
    %c0_i32_1 = arith.constant 0 : i32
    return %c0_i32, %c0_i32_0 : i32, i32
  }
  func.func @transform_5(%arg0: i32) -> (i32, i32) {
    %c0_i32 = arith.constant 0 : i32
    %c0_i32_0 = arith.constant 0 : i32
    %c0_i32_1 = arith.constant 0 : i32
    return %c0_i32, %c0_i32_0 : i32, i32
  }
  func.func @transform_6(%arg0: i32) -> (i32, i32) {
    %c0_i32 = arith.constant 0 : i32
    %c0_i32_0 = arith.constant 0 : i32
    return %c0_i32, %arg0 : i32, i32
  }
}

</mosaic_0001>

<bundles_post_ra>
// kernel: tpu_custom_call.1
= control target key start
LH: loop header
LB: loop body
LE: loop exit
PB: predicated region body
PF: predicated region fallthrough
CT: control target
= control target key end

     0   :  { %v2805_v3 = vmov 0   ;;  %vm703_vm0 = vcmask 424960   ;;  %vm992_vm1 = vcmask 1043456   ;;  %s4039_s0 = inlined_call_operand.vmem [shape: f32[52,128], index: 0, kind: input, shape index: {}]   ;;  %s4040_s1 = inlined_call_operand.vmem [shape: f32[768,52], index: 1, kind: input, shape index: {}]   ;;  %s4041_s2 = inlined_call_operand.vmem [shape: f32[768,1], index: 2, kind: input, shape index: {}]   ;;  %s4042_s3 = inlined_call_operand.vmem [shape: f32[48,768], index: 3, kind: input, shape index: {}]   ;;  %s4043_s4 = inlined_call_operand.vmem [shape: f32[48,1], index: 4, kind: input, shape index: {}]   ;;  %s4044_s5 = inlined_call_operand.vmem [shape: f32[4,16], index: 5, kind: input, shape index: {}]   ;;  %s4045_s6 = inlined_call_operand.hbm [shape: f32[4,128], index: 6, kind: output, shape index: {}]  }
   0x1   :  { %v143_v0 = vld [vmem:[%s4041_s2 + $0x80] sm:$0xff]  ;;  %2764 = vset.pattern.permute.xlu1 %v2805_v3  ;;  %2763 = vset.pattern.permute.xlu0 %v2805_v3  ;;  %v25_v4 = vld [vmem:[%s4039_s0 + $0x8] sm:$0xff]  ;;  %v26_v6 = vld [vmem:[%s4039_s0 + $0x10] sm:$0xff] }
   0x2   :  { %v127_v1 = vld [vmem:[%s4041_s2] sm:$0xff]  ;;  %305 = vperm.xlu0 %2763, %v143_v0   ;;  %v27_v7 = vld [vmem:[%s4039_s0 + $0x18] sm:$0xff]  ;;  %v144_v8 = vld [vmem:[%s4041_s2 + $0x88] sm:$0xff] }
   0x3   :  { %v24_v2 = vld [vmem:[%s4039_s0] sm:$0xff]  ;;  %225 = vperm.xlu1 %2764, %v127_v1   ;;  %v128_v9 = vld [vmem:[%s4041_s2 + $0x8] sm:$0xff]  ;;  %v2643_v10 = vpack.c.bf16 %v27_v7, %v26_v6  ;;  %v145_v14 = vld [vmem:[%s4041_s2 + $0x90] sm:$0xff] }
   0x4   :  { %v2639_v5 = vpack.c.bf16 %v25_v4, %v24_v2  ;;  %v28_v11 = vld [vmem:[%s4039_s0 + $0x20] sm:$0xff]  ;;  %v29_v12 = vld [vmem:[%s4039_s0 + $0x28] sm:$0xff]  ;;  %v146_v15 = vld [vmem:[%s4041_s2 + $0x98] sm:$0xff] }
   0x5   :  { %v31_v13 = vld [vmem:[%s4040_s1] sm:$0xff]  ;;  %v2647_v16 = vpack.c.bf16 %v29_v12, %v28_v11  ;;  %v129_v18 = vld [vmem:[%s4041_s2 + $0x10] sm:$0xff]  ;;  %v130_v19 = vld [vmem:[%s4041_s2 + $0x18] sm:$0xff] }
   0x6   :  { %2640 = vmatprep.subr.bf16.mxu0 %v2639_v5  ;;  %2750 = vmatprep.subr.bf16.mxu1 %v2639_v5  ;;  %v103_v17 = vld [vmem:[%s4040_s1 + $0x240] sm:$0xff]  ;;  %v30_v20 = vld [vmem:[%s4039_s0 + $0x30] sm:$0xf]  ;;  %v32_v21 = vld [vmem:[%s4040_s1 + $0x8] sm:$0xff] }
   0x7   :  { %2642 = vmatpush3.bf16.msra.mxu0 %v2639_v5  ;;  %2754 = vmatpush3.bf16.msra.mxu1 %v2639_v5  ;;  %v147_v22 = vld [vmem:[%s4041_s2 + $0xa0] sm:$0xff]  ;;  %v148_v23 = vld [vmem:[%s4041_s2 + $0xa8] sm:$0xff]  ;;  %v33_v24 = vld [vmem:[%s4040_s1 + $0x10] sm:$0xff] }
   0x8   :  { %310 = vperm.xlu0 %2763, %v144_v8   ;;  %230 = vperm.xlu1 %2764, %v128_v9   ;;  %v104_v25 = vld [vmem:[%s4040_s1 + $0x248] sm:$0xff]  ;;  %v105_v26 = vld [vmem:[%s4040_s1 + $0x250] sm:$0xff]  ;;  %v34_v27 = vld [vmem:[%s4040_s1 + $0x18] sm:$0xff] }
   0x9   :  { %2644 = vmatprep.subr.bf16.mxu0 %v2643_v10  ;;  %2488 = vmatprep.mubr.msk.f32.mxu0 %vm703_vm0, %v31_v13  ;;  %v131_v28 = vld [vmem:[%s4041_s2 + $0x20] sm:$0xff]  ;;  %v132_v29 = vld [vmem:[%s4041_s2 + $0x28] sm:$0xff]  ;;  %v106_v31 = vld [vmem:[%s4040_s1 + $0x258] sm:$0xff] }
   0xa   :  { %2751 = vmatprep.subr.bf16.mxu1 %v2643_v10  ;;  %2596 = vmatprep.mubr.msk.f32.mxu1 %vm703_vm0, %v103_v17  ;;  %v35_v30 = vld [vmem:[%s4040_s1 + $0x20] sm:$0xff]  ;;  %v36_v33 = vld [vmem:[%s4040_s1 + $0x28] sm:$0xff]  ;;  %v149_v34 = vld [vmem:[%s4041_s2 + $0xb0] sm:$0xff] }
   0xb   :  { %2646 = vmatpush3.bf16.msra.mxu0 %v2643_v10  ;;  %2755 = vmatpush3.bf16.msra.mxu1 %v2643_v10  ;;  %v107_v32 = vld [vmem:[%s4040_s1 + $0x260] sm:$0xff]  ;;  %v150_v35 = vld [vmem:[%s4041_s2 + $0xb8] sm:$0xff]  ;;  %v37_v36 = vld [vmem:[%s4040_s1 + $0x30] sm:$0xff] }
   0xc   :  { %315 = vperm.xlu0 %2763, %v145_v14   ;;  %320 = vperm.xlu1 %2764, %v146_v15   ;;  %v108_v37 = vld [vmem:[%s4040_s1 + $0x268] sm:$0xff]  ;;  %v109_v38 = vld [vmem:[%s4040_s1 + $0x270] sm:$0xff]  ;;  %v38_v39 = vld [vmem:[%s4040_s1 + $0x38] sm:$0xff] }
   0xd   :  { %2648 = vmatprep.subr.bf16.mxu0 %v2647_v16  ;;  %2752 = vmatprep.subr.bf16.mxu1 %v2647_v16  ;;  %v133_v40 = vld [vmem:[%s4041_s2 + $0x30] sm:$0xff]  ;;  %v134_v41 = vld [vmem:[%s4041_s2 + $0x38] sm:$0xff]  ;;  %v39_v42 = vld [vmem:[%s4040_s1 + $0x40] sm:$0xff] }
   0xe   :  { %v110_v43 = vld [vmem:[%s4040_s1 + $0x278] sm:$0xff]  ;;  %v111_v44 = vld [vmem:[%s4040_s1 + $0x280] sm:$0xff]  ;;  %v40_v45 = vld [vmem:[%s4040_s1 + $0x48] sm:$0xff] }
   0xf   :  { %2650 = vmatpush3.bf16.msra.mxu0 %v2647_v16  ;;  %2756 = vmatpush3.bf16.msra.mxu1 %v2647_v16  ;;  %v151_v46 = vld [vmem:[%s4041_s2 + $0xc0] sm:$0xff]  ;;  %v152_v47 = vld [vmem:[%s4041_s2 + $0xc8] sm:$0xff]  ;;  %v41_v48 = vld [vmem:[%s4040_s1 + $0x50] sm:$0xff] }
  0x10   :  { %235 = vperm.xlu0 %2763, %v129_v18   ;;  %240 = vperm.xlu1 %2764, %v130_v19   ;;  %v112_v49 = vld [vmem:[%s4040_s1 + $0x288] sm:$0xff]  ;;  %v113_v50 = vld [vmem:[%s4040_s1 + $0x290] sm:$0xff]  ;;  %v42_v51 = vld [vmem:[%s4040_s1 + $0x58] sm:$0xff] }
  0x11   :  { %2486 = vmatprep.subr.msk.mxu0 %vm992_vm1, %v30_v20  ;;  %2753 = vmatprep.subr.msk.mxu1 %vm992_vm1, %v30_v20  ;;  %v135_v52 = vld [vmem:[%s4041_s2 + $0x40] sm:$0xff]  ;;  %v136_v53 = vld [vmem:[%s4041_s2 + $0x48] sm:$0xff]  ;;  %v114_v55 = vld [vmem:[%s4040_s1 + $0x298] sm:$0xff] }
  0x12   :  { %v43_v54 = vld [vmem:[%s4040_s1 + $0x60] sm:$0xff]  ;;  %v44_v57 = vld [vmem:[%s4040_s1 + $0x68] sm:$0xff]  ;;  %v153_v58 = vld [vmem:[%s4041_s2 + $0xd0] sm:$0xff] }
  0x13   :  { %2487 = vmatpush3.msk.msra.mxu0 %vm992_vm1, %v30_v20  ;;  %2757 = vmatpush3.msk.msra.mxu1 %vm992_vm1, %v30_v20  ;;  %v115_v56 = vld [vmem:[%s4040_s1 + $0x2a0] sm:$0xff]  ;;  %v154_v59 = vld [vmem:[%s4041_s2 + $0xd8] sm:$0xff]  ;;  %v45_v60 = vld [vmem:[%s4040_s1 + $0x70] sm:$0xff] }
  0x14   :  { %2489 = vmatmul.mubr.msk.f32.vlgmr.msra.gmra.mrb[0].mxu0 %vm703_vm0, %v32_v21  ;;  %325 = vperm.xlu0 %2763, %v147_v22   ;;  %v116_v61 = vld [vmem:[%s4040_s1 + $0x2a8] sm:$0xff]  ;;  %v117_v62 = vld [vmem:[%s4040_s1 + $0x2b0] sm:$0xff]  ;;  %v46_v63 = vld [vmem:[%s4040_s1 + $0x78] sm:$0xff] }
  0x15   :  { %330 = vperm.xlu1 %2764, %v148_v23   ;;  %2491 = vmatprep.mubr.msk.f32.mxu0 %vm703_vm0, %v33_v24  ;;  %v137_v0 = vld [vmem:[%s4041_s2 + $0x50] sm:$0xff]  ;;  %v138_v1 = vld [vmem:[%s4041_s2 + $0x58] sm:$0xff]  ;;  %v47_v2 = vld [vmem:[%s4040_s1 + $0x80] sm:$0xff] }
  0x16   :  { %2597 = vmatmul.mubr.msk.f32.vlgmr.msra.gmra.mrb[0].mxu1 %vm703_vm0, %v104_v25  ;;  %v118_v3 = vld [vmem:[%s4040_s1 + $0x2b8] sm:$0xff]  ;;  %v119_v4 = vld [vmem:[%s4040_s1 + $0x2c0] sm:$0xff]  ;;  %v48_v5 = vld [vmem:[%s4040_s1 + $0x88] sm:$0xff] }
  0x17   :  { %2599 = vmatprep.mubr.msk.f32.mxu1 %vm703_vm0, %v105_v26  ;;  %v155_v6 = vld [vmem:[%s4041_s2 + $0xe0] sm:$0xff]  ;;  %v156_v7 = vld [vmem:[%s4041_s2 + $0xe8] sm:$0xff]  ;;  %v49_v8 = vld [vmem:[%s4040_s1 + $0x90] sm:$0xff] }
  0x18   :  { %2492 = vmatmul.mubr.msk.f32.gmra.mrb[2].mxu0 %vm703_vm0, %v34_v27  ;;  %245 = vperm.xlu0 %2763, %v131_v28   ;;  %v120_v9 = vld [vmem:[%s4040_s1 + $0x2c8] sm:$0xff]  ;;  %v121_v10 = vld [vmem:[%s4040_s1 + $0x2d0] sm:$0xff]  ;;  %v50_v11 = vld [vmem:[%s4040_s1 + $0x98] sm:$0xff] }
  0x19   :  { %250 = vperm.xlu1 %2764, %v132_v29   ;;  %2494 = vmatprep.mubr.msk.f32.mxu0 %vm703_vm0, %v35_v30  ;;  %v139_v12 = vld [vmem:[%s4041_s2 + $0x60] sm:$0xff]  ;;  %v140_v13 = vld [vmem:[%s4041_s2 + $0x68] sm:$0xff]  ;;  %v122_v15 = vld [vmem:[%s4040_s1 + $0x2d8] sm:$0xff] }
  0x1a   :  { %2600 = vmatmul.mubr.msk.f32.gmra.mrb[2].mxu1 %vm703_vm0, %v106_v31  ;;  %v51_v14 = vld [vmem:[%s4040_s1 + $0xa0] sm:$0xff]  ;;  %v52_v17 = vld [vmem:[%s4040_s1 + $0xa8] sm:$0xff]  ;;  %v157_v18 = vld [vmem:[%s4041_s2 + $0xf0] sm:$0xff] }
  0x1b   :  { %2602 = vmatprep.mubr.msk.f32.mxu1 %vm703_vm0, %v107_v32  ;;  %v123_v16 = vld [vmem:[%s4040_s1 + $0x2e0] sm:$0xff]  ;;  %v158_v19 = vld [vmem:[%s4041_s2 + $0xf8] sm:$0xff]  ;;  %v53_v20 = vld [vmem:[%s4040_s1 + $0xb0] sm:$0xff] }
  0x1c   :  { %2495 = vmatmul.mubr.msk.f32.gmra.mrb[4].mxu0 %vm703_vm0, %v36_v33  ;;  %335 = vperm.xlu0 %2763, %v149_v34   ;;  %v124_v21 = vld [vmem:[%s4040_s1 + $0x2e8] sm:$0xff]  ;;  %v125_v22 = vld [vmem:[%s4040_s1 + $0x2f0] sm:$0xff]  ;;  %v54_v23 = vld [vmem:[%s4040_s1 + $0xb8] sm:$0xff] }
  0x1d   :  { %340 = vperm.xlu1 %2764, %v150_v35   ;;  %2497 = vmatprep.mubr.msk.f32.mxu0 %vm703_vm0, %v37_v36  ;;  %v141_v24 = vld [vmem:[%s4041_s2 + $0x70] sm:$0xff]  ;;  %v142_v25 = vld [vmem:[%s4041_s2 + $0x78] sm:$0xff]  ;;  %v55_v26 = vld [vmem:[%s4040_s1 + $0xc0] sm:$0xff] }
  0x1e   :  { %2603 = vmatmul.mubr.msk.f32.gmra.mrb[4].mxu1 %vm703_vm0, %v108_v37  ;;  %v126_v27 = vld [vmem:[%s4040_s1 + $0x2f8] sm:$0xff]  ;;  %v56_v28 = vld [vmem:[%s4040_s1 + $0xc8] sm:$0xff]  ;;  %v175_v29 = vld [vmem:[%s4041_s2 + $0x180] sm:$0xff] }
  0x1f   :  { %2605 = vmatprep.mubr.msk.f32.mxu1 %vm703_vm0, %v109_v38  ;;  %v176_v30 = vld [vmem:[%s4041_s2 + $0x188] sm:$0xff]  ;;  %v57_v31 = vld [vmem:[%s4040_s1 + $0xd0] sm:$0xff]  ;;  %v58_v32 = vld [vmem:[%s4040_s1 + $0xd8] sm:$0xff] }
  0x20   :  { %2498 = vmatmul.mubr.msk.f32.gmra.mrb[6].mxu0 %vm703_vm0, %v38_v39  ;;  %255 = vperm.xlu0 %2763, %v133_v40   ;;  %v159_v33 = vld [vmem:[%s4041_s2 + $0x100] sm:$0xff] }
  0x21   :  { %260 = vperm.xlu1 %2764, %v134_v41   ;;  %2500 = vmatprep.mubr.msk.f32.mxu0 %vm703_vm0, %v39_v42 }
  0x22   :  { %2606 = vmatmul.mubr.msk.f32.gmra.mrb[6].mxu1 %vm703_vm0, %v110_v43 }
  0x23   :  { %2608 = vmatprep.mubr.msk.f32.mxu1 %vm703_vm0, %v111_v44 }
  0x24   :  { %2501 = vmatmul.mubr.msk.f32.gmra.mrb[8].mxu0 %vm703_vm0, %v40_v45  ;;  %345 = vperm.xlu0 %2763, %v151_v46  }
  0x25   :  { %350 = vperm.xlu1 %2764, %v152_v47   ;;  %2503 = vmatprep.mubr.msk.f32.mxu0 %vm703_vm0, %v41_v48 }
  0x26   :  { %2609 = vmatmul.mubr.msk.f32.gmra.mrb[8].mxu1 %vm703_vm0, %v112_v49 }
  0x27   :  { %2611 = vmatprep.mubr.msk.f32.mxu1 %vm703_vm0, %v113_v50 }
  0x28   :  { %2504 = vmatmul.mubr.msk.f32.gmra.mrb[10].mxu0 %vm703_vm0, %v42_v51  ;;  %265 = vperm.xlu0 %2763, %v135_v52  }
  0x29   :  { %270 = vperm.xlu1 %2764, %v136_v53   ;;  %2506 = vmatprep.mubr.msk.f32.mxu0 %vm703_vm0, %v43_v54 }
  0x2a   :  { %2612 = vmatmul.mubr.msk.f32.gmra.mrb[10].mxu1 %vm703_vm0, %v114_v55 }
  0x2b   :  { %2614 = vmatprep.mubr.msk.f32.mxu1 %vm703_vm0, %v115_v56 }
  0x2c   :  { %2507 = vmatmul.mubr.msk.f32.gmra.mrb[12].mxu0 %vm703_vm0, %v44_v57  ;;  %355 = vperm.xlu0 %2763, %v153_v58  }
  0x2d   :  { %360 = vperm.xlu1 %2764, %v154_v59   ;;  %2509 = vmatprep.mubr.msk.f32.mxu0 %vm703_vm0, %v45_v60 }
  0x2e   :  { %2615 = vmatmul.mubr.msk.f32.gmra.mrb[12].mxu1 %vm703_vm0, %v116_v61 }
  0x2f   :  { %2617 = vmatprep.mubr.msk.f32.mxu1 %vm703_vm0, %v117_v62 }
  0x30   :  { %2510 = vmatmul.mubr.msk.f32.gmra.mrb[14].mxu0 %vm703_vm0, %v46_v63  ;;  %275 = vperm.xlu0 %2763, %v137_v0  }
  0x31   :  { %280 = vperm.xlu1 %2764, %v138_v1   ;;  %2512 = vmatprep.mubr.msk.f32.mxu0 %vm703_vm0, %v47_v2 }
  0x32   :  { %2618 = vmatmul.mubr.msk.f32.gmra.mrb[14].mxu1 %vm703_vm0, %v118_v3 }
  0x33   :  { %2620 = vmatprep.mubr.msk.f32.mxu1 %vm703_vm0, %v119_v4 }
  0x34   :  { %2513 = vmatmul.mubr.msk.f32.gmra.mrb[16].mxu0 %vm703_vm0, %v48_v5  ;;  %365 = vperm.xlu0 %2763, %v155_v6  }
  0x35   :  { %370 = vperm.xlu1 %2764, %v156_v7   ;;  %2515 = vmatprep.mubr.msk.f32.mxu0 %vm703_vm0, %v49_v8 }
  0x36   :  { %2621 = vmatmul.mubr.msk.f32.gmra.mrb[16].mxu1 %vm703_vm0, %v120_v9 }
  0x37   :  { %2623 = vmatprep.mubr.msk.f32.mxu1 %vm703_vm0, %v121_v10 }
  0x38   :  { %2516 = vmatmul.mubr.msk.f32.gmra.mrb[18].mxu0 %vm703_vm0, %v50_v11  ;;  %285 = vperm.xlu0 %2763, %v139_v12  }
  0x39   :  { %290 = vperm.xlu1 %2764, %v140_v13   ;;  %2518 = vmatprep.mubr.msk.f32.mxu0 %vm703_vm0, %v51_v14 }
  0x3a   :  { %2624 = vmatmul.mubr.msk.f32.gmra.mrb[18].mxu1 %vm703_vm0, %v122_v15 }
  0x3b   :  { %2626 = vmatprep.mubr.msk.f32.mxu1 %vm703_vm0, %v123_v16 }
  0x3c   :  { %2519 = vmatmul.mubr.msk.f32.gmra.mrb[20].mxu0 %vm703_vm0, %v52_v17  ;;  %375 = vperm.xlu0 %2763, %v157_v18  }
  0x3d   :  { %380 = vperm.xlu1 %2764, %v158_v19   ;;  %2521 = vmatprep.mubr.msk.f32.mxu0 %vm703_vm0, %v53_v20 }
  0x3e   :  { %2627 = vmatmul.mubr.msk.f32.gmra.mrb[20].mxu1 %vm703_vm0, %v124_v21 }
  0x3f   :  { %2629 = vmatprep.mubr.msk.f32.mxu1 %vm703_vm0, %v125_v22 }
  0x40   :  { %2522 = vmatmul.mubr.msk.f32.gmra.mrb[22].mxu0 %vm703_vm0, %v54_v23  ;;  %295 = vperm.xlu0 %2763, %v141_v24  }
  0x41   :  { %300 = vperm.xlu1 %2764, %v142_v25   ;;  %2524 = vmatprep.mubr.msk.f32.mxu0 %vm703_vm0, %v55_v26 }
  0x42   :  { %2630 = vmatmul.mubr.msk.f32.gmra.mrb[22].mxu1 %vm703_vm0, %v126_v27 }
  0x44   :  { %2525 = vmatmul.mubr.msk.f32.gmra.mrb[24].mxu0 %vm703_vm0, %v56_v28  ;;  %465 = vperm.xlu0 %2763, %v175_v29  }
  0x45   :  { %470 = vperm.xlu1 %2764, %v176_v30   ;;  %2527 = vmatprep.mubr.msk.f32.mxu0 %vm703_vm0, %v57_v31 }
  0x46   :  { %11 = vsyncpa [#allocation3], 0  ;;  %v160_v34 = vld [vmem:[%s4041_s2 + $0x108] sm:$0xff]  ;;  %v59_v35 = vld [vmem:[%s4040_s1 + $0xe0] sm:$0xff]  ;;  %vm2807_vm2 = vmmov 0   ;;  %vm2027_vm3 = vcmask 130048  }
  0x47   :  { %v60_v36 = vld [vmem:[%s4040_s1 + $0xe8] sm:$0xff]  ;;  %v177_v37 = vld [vmem:[%s4041_s2 + $0x190] sm:$0xff]  ;;  %v178_v38 = vld [vmem:[%s4041_s2 + $0x198] sm:$0xff]  ;;  %s2809_s19 = smov [#allocation2]  }
  0x48   :  { %2528 = vmatmul.mubr.msk.f32.gmra.mrb[26].mxu0 %vm703_vm0, %v58_v32  ;;  %385 = vperm.xlu0 %2763, %v159_v33   ;;  %v61_v39 = vld [vmem:[%s4040_s1 + $0xf0] sm:$0xff]  ;;  %v62_v40 = vld [vmem:[%s4040_s1 + $0xf8] sm:$0xff]  ;;  %v63_v43 = vld [vmem:[%s4040_s1 + $0x100] sm:$0xff]  ;;  %s2108_s20 = sshll.u32 %s2809_s19, 4  ;;  %s2109_s20 = int_to_ptr.vmem [resolvable:$true] %s2108_s20 }
  0x49   :  { %390 = vperm.xlu1 %2764, %v160_v34   ;;  %2530 = vmatprep.mubr.msk.f32.mxu0 %vm703_vm0, %v59_v35  ;;  %v161_v41 = vld [vmem:[%s4041_s2 + $0x110] sm:$0xff]  ;;  %v162_v42 = vld [vmem:[%s4041_s2 + $0x118] sm:$0xff]  ;;  %v64_v44 = vld [vmem:[%s4040_s1 + $0x108] sm:$0xff]  ;;  %s2781_s21 = scalar_lea.vmem %s2109_s20, 64  ;;  %p2786_p1 = scmp.lt.s32.totalorder %s2109_s20, %s2109_s20 }
  0x4a   :  { %v179_v45 = vld [vmem:[%s4041_s2 + $0x1a0] sm:$0xff]  ;;  %v180_v46 = vld [vmem:[%s4041_s2 + $0x1a8] sm:$0xff]  ;;  %v65_v47 = vld [vmem:[%s4040_s1 + $0x110] sm:$0xff]  ;;  %p2782_p0 = scmp.ne.s32.totalorder %s2109_s20, %s2781_s21  ;;  %p2787_p2 = scmp.lt.s32.totalorder %s2781_s21, %s2781_s21 }
  0x4b   :  { %v66_v48 = vld [vmem:[%s4040_s1 + $0x118] sm:$0xff]  ;;  %v163_v49 = vld [vmem:[%s4041_s2 + $0x120] sm:$0xff]  ;;  %v164_v50 = vld [vmem:[%s4041_s2 + $0x128] sm:$0xff] }
  0x4c   :  { %2531 = vmatmul.mubr.msk.f32.gmra.mrb[28].mxu0 %vm703_vm0, %v60_v36  ;;  %475 = vperm.xlu0 %2763, %v177_v37   ;;  %v67_v51 = vld [vmem:[%s4040_s1 + $0x120] sm:$0xff]  ;;  %v68_v52 = vld [vmem:[%s4040_s1 + $0x128] sm:$0xff]  ;;  %v181_v53 = vld [vmem:[%s4041_s2 + $0x1b0] sm:$0xff]  ;;  %p2788_p3 = por %p2787_p2, %p2786_p1 }
  0x4d   :  { %480 = vperm.xlu1 %2764, %v178_v38   ;;  %2533 = vmatprep.mubr.msk.f32.mxu0 %vm703_vm0, %v61_v39  ;;  %v182_v54 = vld [vmem:[%s4041_s2 + $0x1b8] sm:$0xff]  ;;  %v69_v55 = vld [vmem:[%s4040_s1 + $0x130] sm:$0xff]  ;;  %v71_v59 = vld [vmem:[%s4040_s1 + $0x140] sm:$0xff] }
  0x4e   :  { %v70_v56 = vld [vmem:[%s4040_s1 + $0x138] sm:$0xff]  ;;  %v165_v57 = vld [vmem:[%s4041_s2 + $0x130] sm:$0xff]  ;;  %v72_v60 = vld [vmem:[%s4040_s1 + $0x148] sm:$0xff]  ;;  %p2789_p4 = pnand %p2788_p3, %p2782_p0 }
  0x4f   :  { %v166_v58 = vld [vmem:[%s4041_s2 + $0x138] sm:$0xff]  ;;  %v183_v61 = vld [vmem:[%s4041_s2 + $0x1c0] sm:$0xff]  ;;  %v184_v62 = vld [vmem:[%s4041_s2 + $0x1c8] sm:$0xff] }
  0x50   :  { %2534 = vmatmul.mubr.msk.f32.gmra.mrb[30].mxu0 %vm703_vm0, %v62_v40  ;;  %395 = vperm.xlu0 %2763, %v161_v41   ;;  %v73_v63 = vld [vmem:[%s4040_s1 + $0x150] sm:$0xff]  ;;  %v74_v0 = vld [vmem:[%s4040_s1 + $0x158] sm:$0xff]  ;;  %v167_v1 = vld [vmem:[%s4041_s2 + $0x140] sm:$0xff] }
  0x51   :  { %400 = vperm.xlu1 %2764, %v162_v42   ;;  %2536 = vmatprep.mubr.msk.f32.mxu0 %vm703_vm0, %v63_v43  ;;  %v168_v2 = vld [vmem:[%s4041_s2 + $0x148] sm:$0xff]  ;;  %v75_v3 = vld [vmem:[%s4040_s1 + $0x160] sm:$0xff]  ;;  %v185_v5 = vld [vmem:[%s4041_s2 + $0x1d0] sm:$0xff] }
  0x52   :  { %v76_v4 = vld [vmem:[%s4040_s1 + $0x168] sm:$0xff]  ;;  %v186_v6 = vld [vmem:[%s4041_s2 + $0x1d8] sm:$0xff]  ;;  %v77_v7 = vld [vmem:[%s4040_s1 + $0x170] sm:$0xff] }
  0x53   :  { %v78_v8 = vld [vmem:[%s4040_s1 + $0x178] sm:$0xff]  ;;  %v169_v9 = vld [vmem:[%s4041_s2 + $0x150] sm:$0xff]  ;;  %v79_v11 = vld [vmem:[%s4040_s1 + $0x180] sm:$0xff] }
  0x54   :  { %2537 = vmatmul.mubr.msk.f32.gmra.mrb[32].mxu0 %vm703_vm0, %v64_v44  ;;  %485 = vperm.xlu0 %2763, %v179_v45   ;;  %v170_v10 = vld [vmem:[%s4041_s2 + $0x158] sm:$0xff]  ;;  %v80_v12 = vld [vmem:[%s4040_s1 + $0x188] sm:$0xff]  ;;  %v187_v13 = vld [vmem:[%s4041_s2 + $0x1e0] sm:$0xff] }
  0x55   :  { %490 = vperm.xlu1 %2764, %v180_v46   ;;  %2539 = vmatprep.mubr.msk.f32.mxu0 %vm703_vm0, %v65_v47  ;;  %v188_v14 = vld [vmem:[%s4041_s2 + $0x1e8] sm:$0xff]  ;;  %v81_v15 = vld [vmem:[%s4040_s1 + $0x190] sm:$0xff]  ;;  %v82_v16 = vld [vmem:[%s4040_s1 + $0x198] sm:$0xff] }
  0x56   :  { %v171_v17 = vld [vmem:[%s4041_s2 + $0x160] sm:$0xff]  ;;  %v172_v18 = vld [vmem:[%s4041_s2 + $0x168] sm:$0xff]  ;;  %v189_v21 = vld [vmem:[%s4041_s2 + $0x1f0] sm:$0xff] }
  0x57   :  { %v83_v19 = vld [vmem:[%s4040_s1 + $0x1a0] sm:$0xff]  ;;  %v84_v20 = vld [vmem:[%s4040_s1 + $0x1a8] sm:$0xff]  ;;  %v190_v22 = vld [vmem:[%s4041_s2 + $0x1f8] sm:$0xff] }
  0x58   :  { %2540 = vmatmul.mubr.msk.f32.gmra.mrb[34].mxu0 %vm703_vm0, %v66_v48  ;;  %405 = vperm.xlu0 %2763, %v163_v49   ;;  %v85_v23 = vld [vmem:[%s4040_s1 + $0x1b0] sm:$0xff]  ;;  %v86_v24 = vld [vmem:[%s4040_s1 + $0x1b8] sm:$0xff]  ;;  %v87_v27 = vld [vmem:[%s4040_s1 + $0x1c0] sm:$0xff] }
  0x59   :  { %410 = vperm.xlu1 %2764, %v164_v50   ;;  %2542 = vmatprep.mubr.msk.f32.mxu0 %vm703_vm0, %v67_v51  ;;  %v173_v25 = vld [vmem:[%s4041_s2 + $0x170] sm:$0xff]  ;;  %v174_v26 = vld [vmem:[%s4041_s2 + $0x178] sm:$0xff]  ;;  %v88_v28 = vld [vmem:[%s4040_s1 + $0x1c8] sm:$0xff] }
  0x5a   :  { %v207_v29 = vld [vmem:[%s4041_s2 + $0x280] sm:$0xff]  ;;  %v208_v30 = vld [vmem:[%s4041_s2 + $0x288] sm:$0xff]  ;;  %v89_v31 = vld [vmem:[%s4040_s1 + $0x1d0] sm:$0xff] }
  0x5b   :  { %v90_v34 = vld [vmem:[%s4040_s1 + $0x1d8] sm:$0xff]  ;;  %v191_v35 = vld [vmem:[%s4041_s2 + $0x200] sm:$0xff]  ;;  %v192_v36 = vld [vmem:[%s4041_s2 + $0x208] sm:$0xff] }
  0x5c   :  { %2543 = vmatmul.mubr.msk.f32.gmra.mrb[36].mxu0 %vm703_vm0, %v68_v52  ;;  %495 = vperm.xlu0 %2763, %v181_v53   ;;  %v91_v37 = vld [vmem:[%s4040_s1 + $0x1e0] sm:$0xff]  ;;  %v92_v40 = vld [vmem:[%s4040_s1 + $0x1e8] sm:$0xff]  ;;  %v209_v41 = vld [vmem:[%s4041_s2 + $0x290] sm:$0xff] }
  0x5d   :  { %500 = vperm.xlu1 %2764, %v182_v54   ;;  %2545 = vmatprep.mubr.msk.f32.mxu0 %vm703_vm0, %v69_v55  ;;  %v210_v42 = vld [vmem:[%s4041_s2 + $0x298] sm:$0xff]  ;;  %v93_v43 = vld [vmem:[%s4040_s1 + $0x1f0] sm:$0xff]  ;;  %v95_v49 = vld [vmem:[%s4040_s1 + $0x200] sm:$0xff] }
  0x5e   :  { %v94_v46 = vld [vmem:[%s4040_s1 + $0x1f8] sm:$0xff]  ;;  %v193_v47 = vld [vmem:[%s4041_s2 + $0x210] sm:$0xff]  ;;  %v96_v52 = vld [vmem:[%s4040_s1 + $0x208] sm:$0xff] }
  0x5f   :  { %v194_v48 = vld [vmem:[%s4041_s2 + $0x218] sm:$0xff]  ;;  %v211_v53 = vld [vmem:[%s4041_s2 + $0x2a0] sm:$0xff]  ;;  %v212_v54 = vld [vmem:[%s4041_s2 + $0x2a8] sm:$0xff] }
  0x60   :  { %2546 = vmatmul.mubr.msk.f32.gmra.mrb[38].mxu0 %vm703_vm0, %v70_v56  ;;  %415 = vperm.xlu0 %2763, %v165_v57   ;;  %v97_v55 = vld [vmem:[%s4040_s1 + $0x210] sm:$0xff] }
  0x61   :  { %420 = vperm.xlu1 %2764, %v166_v58   ;;  %2548 = vmatprep.mubr.msk.f32.mxu0 %vm703_vm0, %v71_v59  ;;  %v98_v58 = vld [vmem:[%s4040_s1 + $0x218] sm:$0xff]  ;;  %v195_v59 = vld [vmem:[%s4041_s2 + $0x220] sm:$0xff] }
  0x64   :  { %2549 = vmatmul.mubr.msk.f32.gmra.mrb[40].mxu0 %vm703_vm0, %v72_v60  ;;  %505 = vperm.xlu0 %2763, %v183_v61   ;;  %v196_v60 = vld [vmem:[%s4041_s2 + $0x228] sm:$0xff]  ;;  %v99_v61 = vld [vmem:[%s4040_s1 + $0x220] sm:$0xff] }
  0x65   :  { %510 = vperm.xlu1 %2764, %v184_v62   ;;  %2551 = vmatprep.mubr.msk.f32.mxu0 %vm703_vm0, %v73_v63 }
  0x68   :  { %2552 = vmatmul.mubr.msk.f32.gmra.mrb[42].mxu0 %vm703_vm0, %v74_v0  ;;  %425 = vperm.xlu0 %2763, %v167_v1   ;;  %v100_v0 = vld [vmem:[%s4040_s1 + $0x228] sm:$0xff]  ;;  %v213_v1 = vld [vmem:[%s4041_s2 + $0x2b0] sm:$0xff] }
  0x69   :  { %430 = vperm.xlu1 %2764, %v168_v2   ;;  %2554 = vmatprep.mubr.msk.f32.mxu0 %vm703_vm0, %v75_v3  ;;  %v214_v2 = vld [vmem:[%s4041_s2 + $0x2b8] sm:$0xff]  ;;  %v101_v3 = vld [vmem:[%s4040_s1 + $0x230] sm:$0xff] }
  0x6c   :  { %2555 = vmatmul.mubr.msk.f32.gmra.mrb[44].mxu0 %vm703_vm0, %v76_v4  ;;  %515 = vperm.xlu0 %2763, %v185_v5  }
  0x6d   :  { %520 = vperm.xlu1 %2764, %v186_v6   ;;  %2557 = vmatprep.mubr.msk.f32.mxu0 %vm703_vm0, %v77_v7  ;;  %v102_v6 = vld [vmem:[%s4040_s1 + $0x238] sm:$0xff]  ;;  %v197_v7 = vld [vmem:[%s4041_s2 + $0x230] sm:$0xff] }
  0x70   :  { %2558 = vmatmul.mubr.msk.f32.gmra.mrb[46].mxu0 %vm703_vm0, %v78_v8  ;;  %435 = vperm.xlu0 %2763, %v169_v9   ;;  %v198_v8 = vld [vmem:[%s4041_s2 + $0x238] sm:$0xff] }
  0x71   :  { %440 = vperm.xlu1 %2764, %v170_v10   ;;  %2560 = vmatprep.mubr.msk.f32.mxu0 %vm703_vm0, %v79_v11  ;;  %v215_v11 = vld [vmem:[%s4041_s2 + $0x2c0] sm:$0xff] }
  0x74   :  { %2561 = vmatmul.mubr.msk.f32.gmra.mrb[48].mxu0 %vm703_vm0, %v80_v12  ;;  %525 = vperm.xlu0 %2763, %v187_v13   ;;  %v216_v12 = vld [vmem:[%s4041_s2 + $0x2c8] sm:$0xff] }
  0x75   :  { %530 = vperm.xlu1 %2764, %v188_v14   ;;  %2563 = vmatprep.mubr.msk.f32.mxu0 %vm703_vm0, %v81_v15  ;;  %v199_v15 = vld [vmem:[%s4041_s2 + $0x240] sm:$0xff] }
  0x78   :  { %2564 = vmatmul.mubr.msk.f32.gmra.mrb[50].mxu0 %vm703_vm0, %v82_v16  ;;  %445 = vperm.xlu0 %2763, %v171_v17   ;;  %v200_v16 = vld [vmem:[%s4041_s2 + $0x248] sm:$0xff] }
  0x79   :  { %450 = vperm.xlu1 %2764, %v172_v18   ;;  %2566 = vmatprep.mubr.msk.f32.mxu0 %vm703_vm0, %v83_v19  ;;  %v217_v19 = vld [vmem:[%s4041_s2 + $0x2d0] sm:$0xff] }
  0x7c   :  { %2567 = vmatmul.mubr.msk.f32.gmra.mrb[52].mxu0 %vm703_vm0, %v84_v20  ;;  %535 = vperm.xlu0 %2763, %v189_v21   ;;  %v218_v20 = vld [vmem:[%s4041_s2 + $0x2d8] sm:$0xff] }
  0x7d   :  { %540 = vperm.xlu1 %2764, %v190_v22   ;;  %2569 = vmatprep.mubr.msk.f32.mxu0 %vm703_vm0, %v85_v23  ;;  %v201_v23 = vld [vmem:[%s4041_s2 + $0x250] sm:$0xff] }
  0x80   :  { %2570 = vmatmul.mubr.msk.f32.gmra.mrb[54].mxu0 %vm703_vm0, %v86_v24  ;;  %455 = vperm.xlu0 %2763, %v173_v25   ;;  %v1638_v24 = vld [vmem:[%s4042_s3 + $0x8] sm:$0xff]  ;;  %v202_v25 = vld [vmem:[%s4041_s2 + $0x258] sm:$0xff] }
  0x81   :  { %460 = vperm.xlu1 %2764, %v174_v26   ;;  %2572 = vmatprep.mubr.msk.f32.mxu0 %vm703_vm0, %v87_v27  ;;  %v3394_v32 = vpop.permute.xlu0 %305 }
  0x82   :  { %v3396_v33 = vpop.permute.xlu1 %225  ;;  %1773 = vmatprep.mubr.f32.mxu1 %v1638_v24 }
  0x84   :  { %2573 = vmatmul.mubr.msk.f32.gmra.mrb[56].mxu0 %vm703_vm0, %v88_v28  ;;  %625 = vperm.xlu0 %2763, %v207_v29   ;;  %v219_v28 = vld [vmem:[%s4041_s2 + $0x2e0] sm:$0xff]  ;;  %v220_v29 = vld [vmem:[%s4041_s2 + $0x2e8] sm:$0xff] }
  0x85   :  { %630 = vperm.xlu1 %2764, %v208_v30   ;;  %2575 = vmatprep.mubr.msk.f32.mxu0 %vm703_vm0, %v89_v31 }
  0x87   :  { %v3412_v38 = vpop.permute.xlu0 %310  ;;  %v3414_v39 = vpop.permute.xlu1 %230 }
  0x88   :  { %2576 = vmatmul.mubr.msk.f32.gmra.mrb[58].mxu0 %vm703_vm0, %v90_v34  ;;  %545 = vperm.xlu0 %2763, %v191_v35   ;;  %v203_v34 = vld [vmem:[%s4041_s2 + $0x260] sm:$0xff]  ;;  %v204_v35 = vld [vmem:[%s4041_s2 + $0x268] sm:$0xff] }
  0x89   :  { %550 = vperm.xlu1 %2764, %v192_v36   ;;  %2578 = vmatprep.mubr.msk.f32.mxu0 %vm703_vm0, %v91_v37 }
  0x8b   :  { %v3430_v44 = vpop.permute.xlu0 %315  ;;  %v3432_v45 = vpop.permute.xlu1 %320 }
  0x8c   :  { %2579 = vmatmul.mubr.msk.f32.gmra.mrb[60].mxu0 %vm703_vm0, %v92_v40  ;;  %635 = vperm.xlu0 %2763, %v209_v41   ;;  %v221_v40 = vld [vmem:[%s4041_s2 + $0x2f0] sm:$0xff]  ;;  %v222_v41 = vld [vmem:[%s4041_s2 + $0x2f8] sm:$0xff] }
  0x8d   :  { %640 = vperm.xlu1 %2764, %v210_v42   ;;  %2581 = vmatprep.mubr.msk.f32.mxu0 %vm703_vm0, %v93_v43 }
  0x8f   :  { %v3448_v50 = vpop.permute.xlu0 %235  ;;  %v3450_v51 = vpop.permute.xlu1 %240 }
  0x90   :  { %2582 = vmatmul.mubr.msk.f32.gmra.mrb[62].mxu0 %vm703_vm0, %v94_v46  ;;  %555 = vperm.xlu0 %2763, %v193_v47   ;;  %v205_v46 = vld [vmem:[%s4041_s2 + $0x270] sm:$0xff]  ;;  %v206_v47 = vld [vmem:[%s4041_s2 + $0x278] sm:$0xff] }
  0x91   :  { %560 = vperm.xlu1 %2764, %v194_v48   ;;  %2584 = vmatprep.mubr.msk.f32.mxu0 %vm703_vm0, %v95_v49 }
  0x93   :  { %v3466_v56 = vpop.permute.xlu0 %325 }
  0x94   :  { %v3468_v57 = vpop.permute.xlu1 %330  ;;  %2585 = vmatmul.mubr.msk.f32.gmra.mrb[64].mxu0 %vm703_vm0, %v96_v52  ;;  %645 = vperm.xlu0 %2763, %v211_v53   ;;  %v1675_v52 = vld [vmem:[%s4043_s4 + $0x10] sm:$0xff]  ;;  %v1676_v53 = vld [vmem:[%s4043_s4 + $0x18] sm:$0xff] }
  0x95   :  { %650 = vperm.xlu1 %2764, %v212_v54   ;;  %2587 = vmatprep.mubr.msk.f32.mxu0 %vm703_vm0, %v97_v55 }
  0x97   :  { %v3484_v62 = vpop.permute.xlu0 %245 }
  0x98   :  { %v3486_v63 = vpop.permute.xlu1 %250  ;;  %2588 = vmatmul.mubr.msk.f32.gmra.mrb[66].mxu0 %vm703_vm0, %v98_v58  ;;  %565 = vperm.xlu0 %2763, %v195_v59   ;;  %v1677_v58 = vld [vmem:[%s4043_s4 + $0x20] sm:$0xff]  ;;  %v1678_v59 = vld [vmem:[%s4043_s4 + $0x28] sm:$0xff] }
  0x99   :  { %570 = vperm.xlu1 %2764, %v196_v60   ;;  %2590 = vmatprep.mubr.msk.f32.mxu0 %vm703_vm0, %v99_v61 }
  0x9b   :  { %v3502_v4 = vpop.permute.xlu0 %335 }
  0x9c   :  { %v3504_v5 = vpop.permute.xlu1 %340  ;;  %2591 = vmatmul.mubr.msk.f32.gmra.mrb[68].mxu0 %vm703_vm0, %v100_v0  ;;  %655 = vperm.xlu0 %2763, %v213_v1   ;;  %v1673_v0 = vld [vmem:[%s4043_s4] sm:$0xff]  ;;  %v1674_v1 = vld [vmem:[%s4043_s4 + $0x8] sm:$0xff] }
  0x9d   :  { %660 = vperm.xlu1 %2764, %v214_v2   ;;  %2593 = vmatprep.mubr.msk.f32.mxu0 %vm703_vm0, %v101_v3 }
  0x9f   :  { %v3517_v9 = vpop.permute.xlu0 %255 }
  0xa0   :  { %v3519_v10 = vpop.permute.xlu1 %260  ;;  %2594 = vmatmul.mubr.msk.f32.gmra.mrb[70].mxu0 %vm703_vm0, %v102_v6  ;;  %575 = vperm.xlu0 %2763, %v197_v7  }
  0xa1   :  { %580 = vperm.xlu1 %2764, %v198_v8  }
  0xa3   :  { %v3528_v13 = vpop.permute.xlu0 %345 }
  0xa4   :  { %v3530_v14 = vpop.permute.xlu1 %350  ;;  %665 = vperm.xlu0 %2763, %v215_v11  }
  0xa5   :  { %670 = vperm.xlu1 %2764, %v216_v12  }
  0xa7   :  { %v3538_v17 = vpop.permute.xlu0 %265 }
  0xa8   :  { %v3540_v18 = vpop.permute.xlu1 %270  ;;  %585 = vperm.xlu0 %2763, %v199_v15  }
  0xa9   :  { %590 = vperm.xlu1 %2764, %v200_v16  }
  0xab   :  { %v3548_v21 = vpop.permute.xlu0 %355 }
  0xac   :  { %v3550_v22 = vpop.permute.xlu1 %360  ;;  %675 = vperm.xlu0 %2763, %v217_v19  }
  0xad   :  { %680 = vperm.xlu1 %2764, %v218_v20  }
  0xaf   :  { %v3561_v26 = vpop.permute.xlu0 %275 }
  0xb0   :  { %v3563_v27 = vpop.permute.xlu1 %280  ;;  %595 = vperm.xlu0 %2763, %v201_v23  }
  0xb1   :  { %600 = vperm.xlu1 %2764, %v202_v25  }
  0xb3   :  { %v3571_v30 = vpop.permute.xlu0 %365 }
  0xb4   :  { %v3573_v31 = vpop.permute.xlu1 %370  ;;  %685 = vperm.xlu0 %2763, %v219_v28  }
  0xb5   :  { %690 = vperm.xlu1 %2764, %v220_v29  }
  0xb7   :  { %v3581_v36 = vpop.permute.xlu0 %285 }
  0xb8   :  { %v3583_v37 = vpop.permute.xlu1 %290  ;;  %605 = vperm.xlu0 %2763, %v203_v34  }
  0xb9   :  { %610 = vperm.xlu1 %2764, %v204_v35  }
  0xbb   :  { %v3591_v42 = vpop.permute.xlu0 %375 }
  0xbc   :  { %v3593_v43 = vpop.permute.xlu1 %380  ;;  %695 = vperm.xlu0 %2763, %v221_v40  }
  0xbd   :  { %700 = vperm.xlu1 %2764, %v222_v41  }
  0xbf   :  { %v3601_v48 = vpop.permute.xlu0 %295 }
  0xc0   :  { %v3603_v49 = vpop.permute.xlu1 %300  ;;  %615 = vperm.xlu0 %2763, %v205_v46  }
  0xc1   :  { %620 = vperm.xlu1 %2764, %v206_v47  }
  0xc3   :  { %v3611_v54 = vpop.permute.xlu0 %465 }
  0xc4   :  { %4046 = vst [vmem:[#allocation5_spill] sm:$0xff] %v3611_v54  ;;  %v3613_v55 = vpop.permute.xlu1 %470  ;;  %1691 = vperm.xlu0 %2763, %v1675_v52  }
  0xc5   :  { %4047 = vst [vmem:[#allocation6_spill] sm:$0xff] %v3613_v55  ;;  %1696 = vperm.xlu1 %2764, %v1676_v53  }
  0xc7   :  { %v3621_v60 = vpop.permute.xlu0 %385 }
  0xc8   :  { %v3623_v61 = vpop.permute.xlu1 %390  ;;  %1701 = vperm.xlu0 %2763, %v1677_v58  }
  0xc9   :  { %1706 = vperm.xlu1 %2764, %v1678_v59  }
  0xcb   :  { %v3631_v2 = vpop.permute.xlu0 %475 }
  0xcc   :  { %4048 = vst [vmem:[#allocation7_spill] sm:$0xff] %v3631_v2  ;;  %v3633_v3 = vpop.permute.xlu1 %480  ;;  %1681 = vperm.xlu0 %2763, %v1673_v0  }
  0xcd   :  { %4049 = vst [vmem:[#allocation8_spill] sm:$0xff] %v3633_v3  ;;  %1686 = vperm.xlu1 %2764, %v1674_v1  }
  0xcf   :  { %v3635_v6 = vpop.permute.xlu0 %395 }
  0xd0   :  { %v3637_v7 = vpop.permute.xlu1 %400 }
  0xd3   :  { %v3639_v8 = vpop.permute.xlu0 %485 }
  0xd4   :  { %4050 = vst [vmem:[#allocation9_spill] sm:$0xff] %v3639_v8  ;;  %v3641_v11 = vpop.permute.xlu1 %490 }
  0xd5   :  { %4051 = vst [vmem:[#allocation10_spill] sm:$0xff] %v3641_v11 }
  0xd7   :  { %v3643_v12 = vpop.permute.xlu0 %405 }
  0xd8   :  { %v3645_v15 = vpop.permute.xlu1 %410 }
  0xdb   :  { %v3647_v16 = vpop.permute.xlu0 %495 }
  0xdc   :  { %4052 = vst [vmem:[#allocation11_spill] sm:$0xff] %v3647_v16  ;;  %v3649_v19 = vpop.permute.xlu1 %500 }
  0xdd   :  { %4053 = vst [vmem:[#allocation12_spill] sm:$0xff] %v3649_v19 }
  0xdf   :  { %v3651_v20 = vpop.permute.xlu0 %415 }
  0xe0   :  { %v3653_v23 = vpop.permute.xlu1 %420 }
  0xe3   :  { %v3655_v24 = vpop.permute.xlu0 %505 }
  0xe4   :  { %4054 = vst [vmem:[#allocation13_spill] sm:$0xff] %v3655_v24  ;;  %v3657_v25 = vpop.permute.xlu1 %510 }
  0xe5   :  { %4055 = vst [vmem:[#allocation14_spill] sm:$0xff] %v3657_v25 }
  0xe7   :  { %v2490_v28 = vpop.f32.mrb[0].mxu0  ;;  %v3659_v29 = vpop.permute.xlu0 %425 }
  0xe8   :  { %4056 = vst [vmem:[#allocation15_spill] sm:$0xff] %v3659_v29  ;;  %v1068_v34 = vadd.f32 %v2490_v28, %v3414_v39  ;;  %v3662_v35 = vpop.permute.xlu1 %430  ;;  %v1062_v40 = vpop.f32.mrb[1].mxu0 }
  0xe9   :  { %v1063_v41 = vadd.f32 %v1062_v40, %v3396_v33  ;;  %v3665_v46 = vpop.f32.mrb[0].mxu1 }
  0xea   :  { %v1542_v47 = vmax.f32 %v1068_v34, 0.0  ;;  %v3667_v52 = vpop.f32.mrb[1].mxu1 }
  0xeb   :  { %v1541_v53 = vmax.f32 %v1063_v41, 0.0  ;;  %v2493_v58 = vpop.f32.mrb[2].mxu0  ;;  %v3669_v59 = vpop.permute.xlu0 %515 }
  0xec   :  { %4057 = vst [vmem:[#allocation16_spill] sm:$0xff] %v3669_v59  ;;  %v1078_v0 = vadd.f32 %v2493_v58, %v3450_v51  ;;  %v3672_v1 = vpop.permute.xlu1 %520  ;;  %v1072_v24 = vpop.f32.mrb[3].mxu0 }
  0xed   :  { %4058 = vst [vmem:[#allocation17_spill] sm:$0xff] %v3672_v1  ;;  %v3674_v39 = vpack.c.bf16 %v1542_v47, %v1541_v53  ;;  %v1073_v28 = vadd.f32 %v1072_v24, %v3448_v50  ;;  %v3677_v25 = vpop.f32.mrb[2].mxu1 }
  0xee   :  { %v1544_v33 = vmax.f32 %v1078_v0, 0.0  ;;  %v3679_v40 = vpop.f32.mrb[3].mxu1 }
  0xef   :  { %v1543_v34 = vmax.f32 %v1073_v28, 0.0  ;;  %v2496_v16 = vpop.f32.mrb[4].mxu0  ;;  %v3681_v41 = vpop.permute.xlu0 %435 }
  0xf0   :  { %4059 = vst [vmem:[#allocation18_spill] sm:$0xff] %v3681_v41  ;;  %v1088_v59 = vadd.f32 %v2496_v16, %v3486_v63  ;;  %v3684_v19 = vpop.permute.xlu1 %440  ;;  %v1082_v51 = vpop.f32.mrb[5].mxu0 }
  0xf1   :  { %4060 = vst [vmem:[#allocation19_spill] sm:$0xff] %v3684_v19  ;;  %v3686_v58 = vpack.c.bf16 %v1544_v33, %v1543_v34  ;;  %v1083_v47 = vadd.f32 %v1082_v51, %v3484_v62  ;;  %v3689_v53 = vpop.f32.mrb[4].mxu1 }
  0xf2   :  { %v1546_v50 = vmax.f32 %v1088_v59, 0.0  ;;  %v3691_v24 = vpop.f32.mrb[5].mxu1 }
  0xf3   :  { %v1545_v0 = vmax.f32 %v1083_v47, 0.0  ;;  %v2499_v1 = vpop.f32.mrb[6].mxu0  ;;  %v3693_v28 = vpop.permute.xlu0 %525 }
  0xf4   :  { %4061 = vst [vmem:[#allocation20_spill] sm:$0xff] %v3693_v28  ;;  %v1098_v8 = vadd.f32 %v2499_v1, %v3519_v10  ;;  %v3696_v11 = vpop.permute.xlu1 %530  ;;  %v1092_v63 = vpop.f32.mrb[7].mxu0 }
  0xf5   :  { %4062 = vst [vmem:[#allocation21_spill] sm:$0xff] %v3696_v11  ;;  %v3698_v16 = vpack.c.bf16 %v1546_v50, %v1545_v0  ;;  %v1093_v33 = vadd.f32 %v1092_v63, %v3517_v9  ;;  %v3701_v34 = vpop.f32.mrb[6].mxu1 }
  0xf6   :  { %4063 = vst [vmem:[#allocation22_spill] sm:$0xff] %v3701_v34  ;;  %v1548_v62 = vmax.f32 %v1098_v8, 0.0  ;;  %v3703_v51 = vpop.f32.mrb[7].mxu1 }
  0xf7   :  { %4064 = vst [vmem:[#allocation23_spill] sm:$0xff] %v3703_v51  ;;  %v1547_v59 = vmax.f32 %v1093_v33, 0.0  ;;  %v2502_v2 = vpop.f32.mrb[8].mxu0  ;;  %v3705_v47 = vpop.permute.xlu0 %445 }
  0xf8   :  { %4065 = vst [vmem:[#allocation24_spill] sm:$0xff] %v3705_v47  ;;  %v1108_v28 = vadd.f32 %v2502_v2, %v3540_v18  ;;  %v3708_v3 = vpop.permute.xlu1 %450  ;;  %v1102_v10 = vpop.f32.mrb[9].mxu0 }
  0xf9   :  { %4066 = vst [vmem:[#allocation25_spill] sm:$0xff] %v3708_v3  ;;  %v3710_v1 = vpack.c.bf16 %v1548_v62, %v1547_v59  ;;  %v1103_v50 = vadd.f32 %v1102_v10, %v3538_v17  ;;  %v2610_v0 = vpop.f32.mrb[8].mxu1 }
  0xfa   :  { %v1550_v9 = vmax.f32 %v1108_v28, 0.0  ;;  %v1462_v63 = vpop.f32.mrb[9].mxu1 }
  0xfb   :  { %v1549_v11 = vmax.f32 %v1103_v50, 0.0  ;;  %v2505_v8 = vpop.f32.mrb[10].mxu0  ;;  %v3713_v54 = vpop.permute.xlu0 %535 }
  0xfc   :  { %4067 = vst [vmem:[#allocation26_spill] sm:$0xff] %v3713_v54  ;;  %v1118_v33 = vadd.f32 %v2505_v8, %v3563_v27  ;;  %v3716_v55 = vpop.permute.xlu1 %540  ;;  %v1112_v47 = vpop.f32.mrb[11].mxu0 }
  0xfd   :  { %4068 = vst [vmem:[#allocation27_spill] sm:$0xff] %v3716_v55  ;;  %v3718_v18 = vpack.c.bf16 %v1550_v9, %v1549_v11  ;;  %v1113_v2 = vadd.f32 %v1112_v47, %v3561_v26  ;;  %v2613_v62 = vpop.f32.mrb[10].mxu1 }
  0xfe   :  { %v1552_v59 = vmax.f32 %v1118_v33, 0.0  ;;  %v1472_v34 = vpop.f32.mrb[11].mxu1 }
  0xff   :  { %v1551_v17 = vmax.f32 %v1113_v2, 0.0  ;;  %v2508_v10 = vpop.f32.mrb[12].mxu0  ;;  %v3721_v28 = vpop.permute.xlu0 %455 }
 0x100   :  { %4069 = vst [vmem:[#allocation28_spill] sm:$0xff] %v3721_v28  ;;  %v1128_v50 = vadd.f32 %v2508_v10, %v3583_v37  ;;  %v3724_v51 = vpop.permute.xlu1 %460  ;;  %v1122_v54 = vpop.f32.mrb[13].mxu0 }
 0x101   :  { %4070 = vst [vmem:[#allocation29_spill] sm:$0xff] %v3724_v51  ;;  %v3726_v27 = vpack.c.bf16 %v1552_v59, %v1551_v17  ;;  %v1123_v8 = vadd.f32 %v1122_v54, %v3581_v36  ;;  %v3729_v11 = vpop.f32.mrb[12].mxu1 }
 0x102   :  { %v1554_v9 = vmax.f32 %v1128_v50, 0.0  ;;  %v3731_v26 = vpop.f32.mrb[13].mxu1 }
 0x103   :  { %v1553_v47 = vmax.f32 %v1123_v8, 0.0  ;;  %v2511_v33 = vpop.f32.mrb[14].mxu0  ;;  %v626_v2 = vpop.permute.xlu0 %625 }
 0x104   :  { %v1138_v55 = vadd.f32 %v2511_v33, %v3603_v49  ;;  %v631_v28 = vpop.permute.xlu1 %630  ;;  %v1132_v3 = vpop.f32.mrb[15].mxu0  ;;  %v1463_v37 = vadd.f32 %v1462_v63, %v626_v2 }
 0x105   :  { %v3734_v10 = vpack.c.bf16 %v1554_v9, %v1553_v47  ;;  %v1468_v51 = vadd.f32 %v2610_v0, %v631_v28  ;;  %v1133_v59 = vadd.f32 %v1132_v3, %v3601_v48  ;;  %v3737_v17 = vpop.f32.mrb[14].mxu1 }
 0x106   :  { %v1556_v36 = vmax.f32 %v1138_v55, 0.0  ;;  %v1621_v54 = vmax.f32 %v1463_v37, 0.0  ;;  %v3739_v50 = vpop.f32.mrb[15].mxu1 }
 0x107   :  { %v1622_v41 = vmax.f32 %v1468_v51, 0.0  ;;  %v1555_v8 = vmax.f32 %v1133_v59, 0.0  ;;  %v2514_v19 = vpop.f32.mrb[16].mxu0  ;;  %v3741_v29 = vpop.permute.xlu0 %545 }
 0x108   :  { %4071 = vst [vmem:[#allocation30_spill] sm:$0xff] %v3741_v29  ;;  %v1148_v49 = vadd.f32 %v2514_v19, %v3412_v38  ;;  %v3744_v33 = vpop.permute.xlu1 %550  ;;  %v1142_v63 = vpop.f32.mrb[17].mxu0 }
 0x109   :  { %4072 = vst [vmem:[#allocation31_spill] sm:$0xff] %v3744_v33  ;;  %v3746_v9 = vpack.c.bf16 %v1556_v36, %v1555_v8  ;;  %v3748_v0 = vpack.c.bf16 %v1622_v41, %v1621_v54  ;;  %v1143_v48 = vadd.f32 %v1142_v63, %v3394_v32  ;;  %v3751_v55 = vpop.f32.mrb[16].mxu1 }
 0x10a   :  { %v1558_v3 = vmax.f32 %v1148_v49, 0.0  ;;  %v3753_v28 = vpop.f32.mrb[17].mxu1 }
 0x10b   :  { %4073 = vst [vmem:[#allocation32_spill] sm:$0xff] %v3748_v0  ;;  %v1557_v51 = vmax.f32 %v1143_v48, 0.0  ;;  %v2517_v47 = vpop.f32.mrb[18].mxu0  ;;  %v636_v2 = vpop.permute.xlu0 %635 }
 0x10c   :  { %v1158_v37 = vadd.f32 %v2517_v47, %v3432_v45  ;;  %v641_v38 = vpop.permute.xlu1 %640  ;;  %v1152_v19 = vpop.f32.mrb[19].mxu0  ;;  %v1473_v59 = vadd.f32 %v1472_v34, %v636_v2 }
 0x10d   :  { %v2651_v29 = vpack.c.bf16 %v1558_v3, %v1557_v51  ;;  %v1478_v36 = vadd.f32 %v2613_v62, %v641_v38  ;;  %v1153_v41 = vadd.f32 %v1152_v19, %v3430_v44  ;;  %v3757_v54 = vpop.f32.mrb[18].mxu1 }
 0x10e   :  { %v1560_v32 = vmax.f32 %v1158_v37, 0.0  ;;  %v1623_v8 = vmax.f32 %v1473_v59, 0.0  ;;  %v3759_v63 = vpop.f32.mrb[19].mxu1 }
 0x10f   :  { %v1624_v49 = vmax.f32 %v1478_v36, 0.0  ;;  %v1559_v0 = vmax.f32 %v1153_v41, 0.0  ;;  %v2520_v48 = vpop.f32.mrb[20].mxu0  ;;  %2652 = vmatprep.subr.bf16.mxu1 %v2651_v29  ;;  %v3761_v33 = vpop.permute.xlu0 %555 }
 0x110   :  { %v1168_v45 = vadd.f32 %v2520_v48, %v3468_v57  ;;  %v3764_v47 = vpop.permute.xlu1 %560  ;;  %v1162_v34 = vpop.f32.mrb[21].mxu0  ;;  %2654 = vmatpush3.bf16.msra.mxu1 %v3674_v39 }
 0x111   :  { %v2655_v44 = vpack.c.bf16 %v1560_v32, %v1559_v0  ;;  %v3767_v62 = vpack.c.bf16 %v1624_v49, %v1623_v8  ;;  %v1163_v3 = vadd.f32 %v1162_v34, %v3466_v56  ;;  %v3770_v51 = vpop.f32.mrb[20].mxu1 }
 0x112   :  { %v1562_v2 = vmax.f32 %v1168_v45, 0.0  ;;  %v3772_v37 = vpop.f32.mrb[21].mxu1 }
 0x113   :  { %v1561_v29 = vmax.f32 %v1163_v3, 0.0  ;;  %v2523_v38 = vpop.f32.mrb[22].mxu0  ;;  %2656 = vmatprep.subr.bf16.mxu1 %v2655_v44  ;;  %v646_v19 = vpop.permute.xlu0 %645 }
 0x114   :  { %v1178_v57 = vadd.f32 %v2523_v38, %v3504_v5  ;;  %v651_v59 = vpop.permute.xlu1 %650  ;;  %v1172_v36 = vpop.f32.mrb[23].mxu0  ;;  %v1483_v39 = vadd.f32 %v3731_v26, %v646_v19  ;;  %2658 = vmatpush3.bf16.msra.mxu1 %v3686_v58 }
 0x115   :  { %v2659_v0 = vpack.c.bf16 %v1562_v2, %v1561_v29  ;;  %v1488_v56 = vadd.f32 %v3729_v11, %v651_v59  ;;  %v1173_v41 = vadd.f32 %v1172_v36, %v3502_v4  ;;  %v3779_v32 = vpop.f32.mrb[22].mxu1 }
 0x116   :  { %v1564_v8 = vmax.f32 %v1178_v57, 0.0  ;;  %v1625_v49 = vmax.f32 %v1483_v39, 0.0  ;;  %v3781_v48 = vpop.f32.mrb[23].mxu1 }
 0x117   :  { %v1626_v45 = vmax.f32 %v1488_v56, 0.0  ;;  %v1563_v34 = vmax.f32 %v1173_v41, 0.0  ;;  %v2526_v5 = vpop.f32.mrb[24].mxu0  ;;  %2660 = vmatprep.subr.bf16.mxu1 %v2659_v0  ;;  %v3783_v44 = vpop.permute.xlu0 %565 }
 0x118   :  { %v1188_v26 = vadd.f32 %v2526_v5, %v3530_v14  ;;  %v3786_v58 = vpop.permute.xlu1 %570  ;;  %v1182_v3 = vpop.f32.mrb[25].mxu0  ;;  %2662 = vmatpush3.bf16.msra.mxu1 %v3698_v16 }
 0x119   :  { %v2663_v4 = vpack.c.bf16 %v1564_v8, %v1563_v34  ;;  %v3789_v11 = vpack.c.bf16 %v1626_v45, %v1625_v49  ;;  %v1183_v2 = vadd.f32 %v1182_v3, %v3528_v13 }
 0x11a   :  { %v1566_v29 = vmax.f32 %v1188_v26, 0.0 }
 0x11b   :  { %v1565_v38 = vmax.f32 %v1183_v2, 0.0  ;;  %v2529_v19 = vpop.f32.mrb[26].mxu0  ;;  %2664 = vmatprep.subr.bf16.mxu1 %v2663_v4  ;;  %v656_v57 = vpop.permute.xlu0 %655 }
 0x11c   :  { %v1198_v59 = vadd.f32 %v2529_v19, %v3550_v22  ;;  %v661_v36 = vpop.permute.xlu1 %660  ;;  %v1192_v39 = vpop.f32.mrb[27].mxu0  ;;  %v1493_v14 = vadd.f32 %v3739_v50, %v656_v57  ;;  %2666 = vmatpush3.bf16.msra.mxu1 %v3710_v1 }
 0x11d   :  { %v2667_v0 = vpack.c.bf16 %v1566_v29, %v1565_v38  ;;  %v1498_v16 = vadd.f32 %v3737_v17, %v661_v36  ;;  %v1193_v56 = vadd.f32 %v1192_v39, %v3548_v21 }
 0x11e   :  { %v1568_v41 = vmax.f32 %v1198_v59, 0.0  ;;  %v1627_v13 = vmax.f32 %v1493_v14, 0.0 }
 0x11f   :  { %v1628_v8 = vmax.f32 %v1498_v16, 0.0  ;;  %v1567_v49 = vmax.f32 %v1193_v56, 0.0  ;;  %v2532_v45 = vpop.f32.mrb[28].mxu0  ;;  %2668 = vmatprep.subr.bf16.mxu1 %v2667_v0  ;;  %v3797_v34 = vpop.permute.xlu0 %575 }
 0x120   :  { %v1208_v22 = vadd.f32 %v2532_v45, %v3573_v31  ;;  %v3800_v5 = vpop.permute.xlu1 %580  ;;  %v1202_v50 = vpop.f32.mrb[29].mxu0  ;;  %2670 = vmatpush3.bf16.msra.mxu1 %v3718_v18 }
 0x121   :  { %v2671_v1 = vpack.c.bf16 %v1568_v41, %v1567_v49  ;;  %v3803_v26 = vpack.c.bf16 %v1628_v8, %v1627_v13  ;;  %v1203_v21 = vadd.f32 %v1202_v50, %v3571_v30 }
 0x122   :  { %v1570_v17 = vmax.f32 %v1208_v22, 0.0 }
 0x123   :  { %v1569_v3 = vmax.f32 %v1203_v21, 0.0  ;;  %v2535_v4 = vpop.f32.mrb[30].mxu0  ;;  %2672 = vmatprep.subr.bf16.mxu1 %v2671_v1  ;;  %v666_v2 = vpop.permute.xlu0 %665 }
 0x124   :  { %v1218_v29 = vadd.f32 %v2535_v4, %v3593_v43  ;;  %v671_v38 = vpop.permute.xlu1 %670  ;;  %v1212_v19 = vpop.f32.mrb[31].mxu0  ;;  %v1503_v31 = vadd.f32 %v3753_v28, %v666_v2  ;;  %2674 = vmatpush3.bf16.msra.mxu1 %v3726_v27 }
 0x125   :  { %v2675_v57 = vpack.c.bf16 %v1570_v17, %v1569_v3  ;;  %v1508_v18 = vadd.f32 %v3751_v55, %v671_v38  ;;  %v1213_v59 = vadd.f32 %v1212_v19, %v3591_v42 }
 0x126   :  { %v1572_v36 = vmax.f32 %v1218_v29, 0.0  ;;  %v1629_v30 = vmax.f32 %v1503_v31, 0.0 }
 0x127   :  { %v1630_v39 = vmax.f32 %v1508_v18, 0.0  ;;  %v1571_v14 = vmax.f32 %v1213_v59, 0.0  ;;  %v2538_v0 = vpop.f32.mrb[32].mxu0  ;;  %2676 = vmatprep.subr.bf16.mxu1 %v2675_v57  ;;  %v586_v16 = vpop.permute.xlu0 %585 }
 0x128   :  { %v1228_v43 = vadd.f32 %v2538_v0, %v3623_v61  ;;  %v1423_v56 = vadd.f32 %v3667_v52, %v586_v16  ;;  %v591_v41 = vpop.permute.xlu1 %590  ;;  %v1222_v28 = vpop.f32.mrb[33].mxu0  ;;  %2678 = vmatpush3.bf16.msra.mxu1 %v3734_v10 }
 0x129   :  { %v2679_v27 = vpack.c.bf16 %v1572_v36, %v1571_v14  ;;  %v3814_v13 = vpack.c.bf16 %v1630_v39, %v1629_v30  ;;  %v1428_v42 = vadd.f32 %v3665_v46, %v591_v41  ;;  %v1223_v55 = vadd.f32 %v1222_v28, %v3621_v60  ;;  %v1637_v46 = vld [vmem:[%s4042_s3] sm:$0xff] }
 0x12a   :  { %v1574_v8 = vmax.f32 %v1228_v43, 0.0  ;;  %v1613_v49 = vmax.f32 %v1423_v56, 0.0 }
 0x12b   :  { %v1614_v45 = vmax.f32 %v1428_v42, 0.0  ;;  %v1573_v22 = vmax.f32 %v1223_v55, 0.0  ;;  %v2541_v50 = vpop.f32.mrb[34].mxu0  ;;  %2680 = vmatprep.subr.bf16.mxu1 %v2679_v27  ;;  %v676_v61 = vpop.permute.xlu0 %675 }
 0x12c   :  { %v1238_v52 = vadd.f32 %v2541_v50, %v3637_v7  ;;  %v681_v1 = vpop.permute.xlu1 %680  ;;  %v1232_v21 = vpop.f32.mrb[35].mxu0  ;;  %v1513_v10 = vadd.f32 %v3759_v63, %v676_v61  ;;  %2682 = vmatpush3.bf16.msra.mxu1 %v3746_v9  ;;  %v1644_v7 = vld [vmem:[%s4042_s3 + $0x38] sm:$0xff] }
 0x12d   :  { %v3824_v60 = vpack.c.bf16 %v1614_v45, %v1613_v49  ;;  %v3826_v17 = vpack.c.bf16 %v1574_v8, %v1573_v22  ;;  %v1518_v3 = vadd.f32 %v3757_v54, %v681_v1  ;;  %v1233_v4 = vadd.f32 %v1232_v21, %v3635_v6  ;;  %v1643_v6 = vld [vmem:[%s4042_s3 + $0x30] sm:$0xff] }
 0x12e   :  { %v1576_v2 = vmax.f32 %v1238_v52, 0.0  ;;  %v1631_v63 = vmax.f32 %v1513_v10, 0.0 }
 0x12f   :  { %v1632_v29 = vmax.f32 %v1518_v3, 0.0  ;;  %v1575_v9 = vmax.f32 %v1233_v4, 0.0  ;;  %v2544_v38 = vpop.f32.mrb[36].mxu0  ;;  %1774 = vmatmul.mubr.f32.vlgmr.msra.gmra.mrb[24].mxu1 %v1637_v46  ;;  %v596_v19 = vpop.permute.xlu0 %595 }
 0x130   :  { %v1248_v31 = vadd.f32 %v2544_v38, %v3645_v15  ;;  %v1433_v57 = vadd.f32 %v3679_v40, %v596_v19  ;;  %v601_v18 = vpop.permute.xlu1 %600  ;;  %v1242_v59 = vpop.f32.mrb[37].mxu0  ;;  %1778 = vmatprep.mubr.f32.mxu1 %v1644_v7  ;;  %v1650_v15 = vld [vmem:[%s4042_s3 + $0x68] sm:$0xff]  ;;  %v4074_v7 = vld [vmem:[#allocation15_spill] sm:$0xff] }
 0x131   :  { %v3838_v54 = vpack.c.bf16 %v1576_v2, %v1575_v9  ;;  %v3840_v36 = vpack.c.bf16 %v1632_v29, %v1631_v63  ;;  %v1438_v30 = vadd.f32 %v3677_v25, %v601_v18  ;;  %v1243_v39 = vadd.f32 %v1242_v59, %v3643_v12  ;;  %v1649_v12 = vld [vmem:[%s4042_s3 + $0x60] sm:$0xff] }
 0x132   :  { %v1578_v40 = vmax.f32 %v1248_v31, 0.0  ;;  %v1615_v14 = vmax.f32 %v1433_v57, 0.0  ;;  %v4075_v31 = vld [vmem:[#allocation19_spill] sm:$0xff] }
 0x133   :  { %v1616_v0 = vmax.f32 %v1438_v30, 0.0  ;;  %v1577_v16 = vmax.f32 %v1243_v39, 0.0  ;;  %v2547_v43 = vpop.f32.mrb[38].mxu0  ;;  %1779 = vmatmul.mubr.f32.gmra.mrb[26].mxu1 %v1643_v6  ;;  %v686_v56 = vpop.permute.xlu0 %685 }
 0x134   :  { %v1258_v41 = vadd.f32 %v2547_v43, %v3653_v23  ;;  %v691_v28 = vpop.permute.xlu1 %690  ;;  %v1252_v27 = vpop.f32.mrb[39].mxu0  ;;  %v1523_v42 = vadd.f32 %v3772_v37, %v686_v56  ;;  %1783 = vmatprep.mubr.f32.mxu1 %v1650_v15  ;;  %v1656_v23 = vld [vmem:[%s4042_s3 + $0x98] sm:$0xff] }
 0x135   :  { %v3852_v25 = vpack.c.bf16 %v1616_v0, %v1615_v14  ;;  %v3854_v55 = vpack.c.bf16 %v1578_v40, %v1577_v16  ;;  %v1528_v8 = vadd.f32 %v3770_v51, %v691_v28  ;;  %v1253_v49 = vadd.f32 %v1252_v27, %v3651_v20  ;;  %v1655_v20 = vld [vmem:[%s4042_s3 + $0x90] sm:$0xff]  ;;  %v1668_v0 = vld [vmem:[%s4042_s3 + $0xf8] sm:$0xff]  ;;  %v4077_v27 = vld [vmem:[#allocation25_spill] sm:$0xff] }
 0x136   :  { %v1580_v45 = vmax.f32 %v1258_v41, 0.0  ;;  %v1633_v22 = vmax.f32 %v1523_v42, 0.0  ;;  %v4076_v40 = vld [vmem:[#allocation18_spill] sm:$0xff] }
 0x137   :  { %v1634_v37 = vmax.f32 %v1528_v8, 0.0  ;;  %v1579_v50 = vmax.f32 %v1253_v49, 0.0  ;;  %v2550_v61 = vpop.f32.mrb[40].mxu0  ;;  %1784 = vmatmul.mubr.f32.gmra.mrb[28].mxu1 %v1649_v12  ;;  %v606_v52 = vpop.permute.xlu0 %605  ;;  %v4078_v12 = vld [vmem:[#allocation23_spill] sm:$0xff] }
 0x138   :  { %v1268_v1 = vadd.f32 %v2550_v61, %v3662_v35  ;;  %v1443_v21 = vadd.f32 %v3691_v24, %v606_v52  ;;  %v611_v10 = vpop.permute.xlu1 %610  ;;  %v1262_v46 = vpop.f32.mrb[41].mxu0  ;;  %1788 = vmatprep.mubr.f32.mxu1 %v1656_v23  ;;  %v1662_v35 = vld [vmem:[%s4042_s3 + $0xc8] sm:$0xff]  ;;  %v4080_v61 = vld [vmem:[#allocation24_spill] sm:$0xff] }
 0x139   :  { %v3866_v51 = vpack.c.bf16 %v1580_v45, %v1579_v50  ;;  %v3868_v3 = vpack.c.bf16 %v1634_v37, %v1633_v22  ;;  %v1448_v4 = vadd.f32 %v3689_v53, %v611_v10  ;;  %v1263_v2 = vadd.f32 %v1262_v46, %v4074_v7  ;;  %v1661_v53 = vld [vmem:[%s4042_s3 + $0xc0] sm:$0xff]  ;;  %v4079_v37 = vld [vmem:[#allocation22_spill] sm:$0xff] }
 0x13a   :  { %v1582_v24 = vmax.f32 %v1268_v1, 0.0  ;;  %v1617_v63 = vmax.f32 %v1443_v21, 0.0  ;;  %v1640_v1 = vld [vmem:[%s4042_s3 + $0x18] sm:$0xff]  ;;  %v4081_v7 = vld [vmem:[#allocation29_spill] sm:$0xff] }
 0x13b   :  { %v1618_v29 = vmax.f32 %v1448_v4, 0.0  ;;  %v1581_v9 = vmax.f32 %v1263_v2, 0.0  ;;  %v2553_v38 = vpop.f32.mrb[42].mxu0  ;;  %1789 = vmatmul.mubr.f32.gmra.mrb[30].mxu1 %v1655_v20  ;;  %v696_v19 = vpop.permute.xlu0 %695 }
 0x13c   :  { %v1278_v57 = vadd.f32 %v2553_v38, %v4075_v31  ;;  %v701_v18 = vpop.permute.xlu1 %700  ;;  %v1272_v59 = vpop.f32.mrb[43].mxu0  ;;  %v1533_v6 = vadd.f32 %v3781_v48, %v696_v19  ;;  %1793 = vmatprep.mubr.f32.mxu1 %v1662_v35 }
 0x13d   :  { %v3880_v30 = vpack.c.bf16 %v1618_v29, %v1617_v63  ;;  %v3882_v39 = vpack.c.bf16 %v1582_v24, %v1581_v9  ;;  %v1538_v15 = vadd.f32 %v3779_v32, %v701_v18  ;;  %v1273_v14 = vadd.f32 %v1272_v59, %v4076_v40  ;;  %v1667_v32 = vld [vmem:[%s4042_s3 + $0xf0] sm:$0xff]  ;;  %v4082_v29 = vld [vmem:[#allocation28_spill] sm:$0xff] }
 0x13e   :  { %v1584_v16 = vmax.f32 %v1278_v57, 0.0  ;;  %v1635_v43 = vmax.f32 %v1533_v6, 0.0  ;;  %v4083_v57 = vld [vmem:[#allocation6_spill] sm:$0xff] }
 0x13f   :  { %v1636_v48 = vmax.f32 %v1538_v15, 0.0  ;;  %v1583_v56 = vmax.f32 %v1273_v14, 0.0  ;;  %v2556_v41 = vpop.f32.mrb[44].mxu0  ;;  %1794 = vmatmul.mubr.f32.gmra.mrb[32].mxu1 %v1661_v53  ;;  %v616_v28 = vpop.permute.xlu0 %615  ;;  %v4084_v53 = vld [vmem:[#allocation5_spill] sm:$0xff] }
 0x140   :  { %v1288_v42 = vadd.f32 %v2556_v41, %v4077_v27  ;;  %v1453_v8 = vadd.f32 %v4078_v12, %v616_v28  ;;  %v621_v49 = vpop.permute.xlu1 %620  ;;  %v1282_v23 = vpop.f32.mrb[45].mxu0  ;;  %1798 = vmatprep.mubr.f32.mxu1 %v1668_v0  ;;  %v4086_v41 = vld [vmem:[#allocation7_spill] sm:$0xff] }
 0x141   :  { %v3894_v45 = vpack.c.bf16 %v1584_v16, %v1583_v56  ;;  %v3896_v22 = vpack.c.bf16 %v1636_v48, %v1635_v43  ;;  %v1458_v50 = vadd.f32 %v4079_v37, %v621_v49  ;;  %v1283_v52 = vadd.f32 %v1282_v23, %v4080_v61  ;;  %v4085_v16 = vld [vmem:[#allocation8_spill] sm:$0xff]  ;;  %v4088_v37 = vld [vmem:[#allocation9_spill] sm:$0xff] }
 0x142   :  { %v1586_v21 = vmax.f32 %v1288_v42, 0.0  ;;  %v1619_v10 = vmax.f32 %v1453_v8, 0.0  ;;  %v4087_v8 = vld [vmem:[#allocation10_spill] sm:$0xff] }
 0x143   :  { %v1620_v46 = vmax.f32 %v1458_v50, 0.0  ;;  %v1585_v20 = vmax.f32 %v1283_v52, 0.0  ;;  %v2559_v4 = vpop.f32.mrb[46].mxu0  ;;  %1799 = vmatmul.mubr.f32.gmra.mrb[34].mxu1 %v1667_v32 }
 0x144   :  { %v1298_v2 = vadd.f32 %v2559_v4, %v4081_v7  ;;  %v1292_v35 = vpop.f32.mrb[47].mxu0  ;;  %1868 = vmatprep.mubr.f32.mxu1 %v1640_v1  ;;  %v4090_v4 = vld [vmem:[#allocation11_spill] sm:$0xff] }
 0x145   :  { %v3904_v24 = vpack.c.bf16 %v1620_v46, %v1619_v10  ;;  %v3906_v63 = vpack.c.bf16 %v1586_v21, %v1585_v20  ;;  %v1293_v9 = vadd.f32 %v1292_v35, %v4082_v29  ;;  %v4089_v21 = vld [vmem:[#allocation12_spill] sm:$0xff] }
 0x146   :  { %v1588_v38 = vmax.f32 %v1298_v2, 0.0 }
 0x147   :  { %v1587_v19 = vmax.f32 %v1293_v9, 0.0  ;;  %v2562_v31 = vpop.f32.mrb[48].mxu0 }
 0x148   :  { %v1308_v18 = vadd.f32 %v2562_v31, %v4083_v57  ;;  %v1302_v59 = vpop.f32.mrb[49].mxu0  ;;  %v4092_v31 = vld [vmem:[#allocation13_spill] sm:$0xff] }
 0x149   :  { %v3910_v6 = vpack.c.bf16 %v1588_v38, %v1587_v19  ;;  %v1303_v15 = vadd.f32 %v1302_v59, %v4084_v53 }
 0x14a   :  { %v1590_v40 = vmax.f32 %v1308_v18, 0.0 }
 0x14b   :  { %v1589_v14 = vmax.f32 %v1303_v15, 0.0  ;;  %v2565_v0 = vpop.f32.mrb[50].mxu0 }
 0x14c   :  { %v1318_v43 = vadd.f32 %v2565_v0, %v4085_v16  ;;  %v1312_v48 = vpop.f32.mrb[51].mxu0  ;;  %v4094_v0 = vld [vmem:[#allocation16_spill] sm:$0xff] }
 0x14d   :  { %v2683_v56 = vpack.c.bf16 %v1590_v40, %v1589_v14  ;;  %v1313_v28 = vadd.f32 %v1312_v48, %v4086_v41 }
 0x14e   :  { %v1592_v27 = vmax.f32 %v1318_v43, 0.0 }
 0x14f   :  { %v1591_v42 = vmax.f32 %v1313_v28, 0.0  ;;  %v2568_v12 = vpop.f32.mrb[52].mxu0  ;;  %2684 = vmatprep.subr.bf16.mxu1 %v2683_v56 }
 0x150   :  { %v1328_v49 = vadd.f32 %v2568_v12, %v4087_v8  ;;  %v1322_v23 = vpop.f32.mrb[53].mxu0  ;;  %2686 = vmatpush3.bf16.msra.mxu1 %v3826_v17  ;;  %v4091_v17 = vld [vmem:[#allocation14_spill] sm:$0xff] }
 0x151   :  { %v2687_v32 = vpack.c.bf16 %v1592_v27, %v1591_v42  ;;  %v1323_v50 = vadd.f32 %v1322_v23, %v4088_v37  ;;  %v4096_v42 = vld [vmem:[#allocation20_spill] sm:$0xff] }
 0x152   :  { %v1594_v61 = vmax.f32 %v1328_v49, 0.0 }
 0x153   :  { %v1593_v52 = vmax.f32 %v1323_v50, 0.0  ;;  %v2571_v1 = vpop.f32.mrb[54].mxu0  ;;  %2688 = vmatprep.subr.bf16.mxu1 %v2687_v32 }
 0x154   :  { %v1338_v10 = vadd.f32 %v2571_v1, %v4089_v21  ;;  %v1332_v46 = vpop.f32.mrb[55].mxu0  ;;  %2690 = vmatpush3.bf16.msra.mxu1 %v3838_v54  ;;  %v4093_v54 = vld [vmem:[#allocation17_spill] sm:$0xff] }
 0x155   :  { %v2691_v20 = vpack.c.bf16 %v1594_v61, %v1593_v52  ;;  %v1333_v7 = vadd.f32 %v1332_v46, %v4090_v4  ;;  %v4098_v61 = vld [vmem:[#allocation26_spill] sm:$0xff] }
 0x156   :  { %v1596_v2 = vmax.f32 %v1338_v10, 0.0 }
 0x157   :  { %v1595_v35 = vmax.f32 %v1333_v7, 0.0  ;;  %v2574_v29 = vpop.f32.mrb[56].mxu0  ;;  %2692 = vmatprep.subr.bf16.mxu1 %v2691_v20  ;;  %v4100_v7 = vld [vmem:[#allocation30_spill] sm:$0xff] }
 0x158   :  { %v1348_v9 = vadd.f32 %v2574_v29, %v4091_v17  ;;  %v1342_v38 = vpop.f32.mrb[57].mxu0  ;;  %2694 = vmatpush3.bf16.msra.mxu1 %v3854_v55  ;;  %v4095_v55 = vld [vmem:[#allocation21_spill] sm:$0xff] }
 0x159   :  { %v2695_v19 = vpack.c.bf16 %v1596_v2, %v1595_v35  ;;  %v1343_v57 = vadd.f32 %v1342_v38, %v4092_v31  ;;  %v1639_v38 = vld [vmem:[%s4042_s3 + $0x10] sm:$0xff] }
 0x15a   :  { %v1598_v18 = vmax.f32 %v1348_v9, 0.0 }
 0x15b   :  { %v1597_v59 = vmax.f32 %v1343_v57, 0.0  ;;  %v2577_v53 = vpop.f32.mrb[58].mxu0  ;;  %2696 = vmatprep.subr.bf16.mxu1 %v2695_v19  ;;  %v1646_v57 = vld [vmem:[%s4042_s3 + $0x48] sm:$0xff] }
 0x15c   :  { %v1358_v15 = vadd.f32 %v2577_v53, %v4093_v54  ;;  %v1352_v40 = vpop.f32.mrb[59].mxu0  ;;  %2698 = vmatpush3.bf16.msra.mxu1 %v3866_v51  ;;  %v4097_v51 = vld [vmem:[#allocation27_spill] sm:$0xff]  ;;  %v1645_v54 = vld [vmem:[%s4042_s3 + $0x40] sm:$0xff] }
 0x15d   :  { %v2699_v14 = vpack.c.bf16 %v1598_v18, %v1597_v59  ;;  %v1353_v16 = vadd.f32 %v1352_v40, %v4094_v0  ;;  %v1652_v40 = vld [vmem:[%s4042_s3 + $0x78] sm:$0xff] }
 0x15e   :  { %v1600_v43 = vmax.f32 %v1358_v15, 0.0 }
 0x15f   :  { %v1599_v48 = vmax.f32 %v1353_v16, 0.0  ;;  %v2580_v56 = vpop.f32.mrb[60].mxu0  ;;  %2700 = vmatprep.subr.bf16.mxu1 %v2699_v14 }
 0x160   :  { %v1368_v41 = vadd.f32 %v2580_v56, %v4095_v55  ;;  %v1362_v28 = vpop.f32.mrb[61].mxu0  ;;  %2702 = vmatpush3.bf16.msra.mxu1 %v3882_v39  ;;  %v4099_v39 = vld [vmem:[#allocation31_spill] sm:$0xff]  ;;  %v1658_v56 = vld [vmem:[%s4042_s3 + $0xa8] sm:$0xff] }
 0x161   :  { %v2703_v27 = vpack.c.bf16 %v1600_v43, %v1599_v48  ;;  %v1363_v12 = vadd.f32 %v1362_v28, %v4096_v42  ;;  %v1651_v48 = vld [vmem:[%s4042_s3 + $0x70] sm:$0xff]  ;;  %v1642_v42 = vld [vmem:[%s4042_s3 + $0x28] sm:$0xff] }
 0x162   :  { %v1602_v8 = vmax.f32 %v1368_v41, 0.0 }
 0x163   :  { %v1601_v49 = vmax.f32 %v1363_v12, 0.0  ;;  %v2583_v23 = vpop.f32.mrb[62].mxu0  ;;  %2704 = vmatprep.subr.bf16.mxu1 %v2703_v27  ;;  %v1670_v27 = vld [vmem:[%s4042_s3 + $0x108] sm:$0xff]  ;;  %v1665_v12 = vld [vmem:[%s4042_s3 + $0xe0] sm:$0xff] }
 0x164   :  { %v1378_v32 = vadd.f32 %v2583_v23, %v4097_v51  ;;  %v1372_v37 = vpop.f32.mrb[63].mxu0  ;;  %2706 = vmatpush3.bf16.msra.mxu1 %v3894_v45 }
 0x165   :  { %v2707_v50 = vpack.c.bf16 %v1602_v8, %v1601_v49  ;;  %v1373_v52 = vadd.f32 %v1372_v37, %v4098_v61  ;;  %v1672_v8 = vld [vmem:[%s4042_s3 + $0x118] sm:$0xff]  ;;  %v1671_v49 = vld [vmem:[%s4042_s3 + $0x110] sm:$0xff] }
 0x166   :  { %v1604_v1 = vmax.f32 %v1378_v32, 0.0 }
 0x167   :  { %v1603_v21 = vmax.f32 %v1373_v52, 0.0  ;;  %v2586_v10 = vpop.f32.mrb[64].mxu0  ;;  %2708 = vmatprep.subr.bf16.mxu1 %v2707_v50 }
 0x168   :  { %v1388_v46 = vadd.f32 %v2586_v10, %v4099_v39  ;;  %v1382_v20 = vpop.f32.mrb[65].mxu0  ;;  %2710 = vmatpush3.bf16.msra.mxu1 %v3906_v63  ;;  %v4101_v63 = vld [vmem:[#allocation32_spill] sm:$0xff]  ;;  %v2806_v10 = vmov 0.0|0.0  }
 0x169   :  { %v2711_v4 = vpack.c.bf16 %v1604_v1, %v1603_v21  ;;  %v1383_v2 = vadd.f32 %v1382_v20, %v4100_v7 }
 0x16a   :  { %v1606_v35 = vmax.f32 %v1388_v46, 0.0 }
 0x16b   :  { %v1605_v29 = vmax.f32 %v1383_v2, 0.0  ;;  %v2589_v17 = vpop.f32.mrb[66].mxu0  ;;  %2712 = vmatprep.subr.bf16.mxu1 %v2711_v4 }
 0x16c   :  { %v1398_v45 = vadd.f32 %v2589_v17, %v3764_v47  ;;  %v1392_v9 = vpop.f32.mrb[67].mxu0  ;;  %2714 = vmatpush3.bf16.msra.mxu1 %v3910_v6 }
 0x16d   :  { %v2717_v19 = vpack.c.bf16 %v1606_v35, %v1605_v29  ;;  %v1393_v31 = vadd.f32 %v1392_v9, %v3761_v33  ;;  %2716 = vmatprep.subr.bf16.mxu1 %v4101_v63  ;;  %v1692_v9 = vpop.permute.xlu0 %1691 }
 0x16e   :  { %v1608_v18 = vmax.f32 %v1398_v45, 0.0  ;;  %v2808_v45 = vmov 0.0  }
 0x16f   :  { %v1607_v59 = vmax.f32 %v1393_v31, 0.0  ;;  %v2592_v53 = vpop.f32.mrb[68].mxu0  ;;  %1869 = vmatmul.mubr.f32.vlgmr.msra.gmra.mrb[36].mxu1 %v1639_v38  ;;  %v1697_v38 = vpop.permute.xlu1 %1696 }
 0x170   :  { %v1408_v47 = vadd.f32 %v2592_v53, %v3786_v58  ;;  %v1402_v6 = vpop.f32.mrb[69].mxu0  ;;  %2718 = vmatpush3.bf16.msra.mxu1 %v2717_v19  ;;  %1873 = vmatprep.mubr.f32.mxu1 %v1646_v57 }
 0x171   :  { %v2721_v33 = vpack.c.bf16 %v1608_v18, %v1607_v59  ;;  %v1403_v15 = vadd.f32 %v1402_v6, %v3783_v44  ;;  %2720 = vmatprep.subr.bf16.mxu1 %v3767_v62  ;;  %v1702_v19 = vpop.permute.xlu0 %1701 }
 0x172   :  { %v1610_v14 = vmax.f32 %v1408_v47, 0.0 }
 0x173   :  { %v1609_v0 = vmax.f32 %v1403_v15, 0.0  ;;  %v2595_v16 = vpop.f32.mrb[70].mxu0  ;;  %1874 = vmatmul.mubr.f32.gmra.mrb[38].mxu1 %v1645_v54  ;;  %v1707_v31 = vpop.permute.xlu1 %1706 }
 0x174   :  { %v1418_v58 = vadd.f32 %v2595_v16, %v3800_v5  ;;  %v1412_v43 = vpop.f32.mrb[71].mxu0  ;;  %2722 = vmatpush3.bf16.msra.mxu1 %v2721_v33  ;;  %1878 = vmatprep.mubr.f32.mxu1 %v1652_v40  ;;  %v1657_v5 = vld [vmem:[%s4042_s3 + $0xa0] sm:$0xff] }
 0x175   :  { %v2725_v44 = vpack.c.bf16 %v1610_v14, %v1609_v0  ;;  %v1413_v62 = vadd.f32 %v1412_v43, %v3797_v34  ;;  %2724 = vmatprep.subr.bf16.mxu1 %v3789_v11  ;;  %v1664_v11 = vld [vmem:[%s4042_s3 + $0xd8] sm:$0xff]  ;;  %v1663_v34 = vld [vmem:[%s4042_s3 + $0xd0] sm:$0xff]  ;;  %v1682_v57 = vpop.permute.xlu0 %1681 }
 0x176   :  { %v1612_v55 = vmax.f32 %v1418_v58, 0.0 }
 0x177   :  { %v1611_v41 = vmax.f32 %v1413_v62, 0.0  ;;  %1879 = vmatmul.mubr.f32.gmra.mrb[40].mxu1 %v1651_v48  ;;  %v1687_v54 = vpop.permute.xlu1 %1686 }
 0x178   :  { %2726 = vmatpush3.bf16.msra.mxu1 %v2725_v44  ;;  %1883 = vmatprep.mubr.f32.mxu1 %v1658_v56 }
 0x179   :  { %v2729_v28 = vpack.c.bf16 %v1612_v55, %v1611_v41  ;;  %2728 = vmatprep.subr.bf16.mxu1 %v3803_v26  ;;  %v1669_v26 = vld [vmem:[%s4042_s3 + $0x100] sm:$0xff] }
 0x17b   :  { %1884 = vmatmul.mubr.f32.gmra.mrb[42].mxu1 %v1657_v5 }
 0x17c   :  { %2730 = vmatpush3.bf16.msra.mxu1 %v2729_v28  ;;  %1888 = vmatprep.mubr.f32.mxu1 %v1664_v11 }
 0x17d   :  { %2732 = vmatprep.subr.bf16.mxu1 %v3814_v13  ;;  %v1641_v13 = vld [vmem:[%s4042_s3 + $0x20] sm:$0xff] }
 0x17f   :  { %1889 = vmatmul.mubr.f32.gmra.mrb[44].mxu1 %v1663_v34 }
 0x180   :  { %2734 = vmatpush3.bf16.msra.mxu1 %v3824_v60  ;;  %1893 = vmatprep.mubr.f32.mxu1 %v1670_v27  ;;  %v1648_v60 = vld [vmem:[%s4042_s3 + $0x58] sm:$0xff] }
 0x181   :  { %2736 = vmatprep.subr.bf16.mxu1 %v3840_v36  ;;  %v1647_v36 = vld [vmem:[%s4042_s3 + $0x50] sm:$0xff] }
 0x183   :  { %1894 = vmatmul.mubr.f32.gmra.mrb[46].mxu1 %v1669_v26 }
 0x184   :  { %2738 = vmatpush3.bf16.msra.mxu1 %v3852_v25  ;;  %1963 = vmatprep.mubr.f32.mxu1 %v1642_v42  ;;  %v1654_v25 = vld [vmem:[%s4042_s3 + $0x88] sm:$0xff] }
 0x185   :  { %2740 = vmatprep.subr.bf16.mxu1 %v3868_v3  ;;  %v1653_v3 = vld [vmem:[%s4042_s3 + $0x80] sm:$0xff] }
 0x188   :  { %2742 = vmatpush3.bf16.msra.mxu1 %v3880_v30  ;;  %v1660_v30 = vld [vmem:[%s4042_s3 + $0xb8] sm:$0xff] }
 0x189   :  { %2744 = vmatprep.subr.bf16.mxu1 %v3896_v22  ;;  %v1659_v22 = vld [vmem:[%s4042_s3 + $0xb0] sm:$0xff] }
 0x18c   :  { %2746 = vmatpush3.bf16.msra.mxu1 %v3904_v24  ;;  %v1666_v24 = vld [vmem:[%s4042_s3 + $0xe8] sm:$0xff] }
 0x18d   :  { %2747 = vmatprep.subr.bf16.mxu1 %v2806_v10 }
 0x18f   :  { %1964 = vmatmul.mubr.f32.vlgmr.msra.gmra.mrb[48].mxu1 %v1641_v13 }
 0x190   :  { %1968 = vmatprep.mubr.f32.mxu1 %v1648_v60 }
 0x193   :  { %1969 = vmatmul.mubr.f32.gmra.mrb[50].mxu1 %v1647_v36 }
 0x194   :  { %1973 = vmatprep.mubr.f32.mxu1 %v1654_v25 }
 0x197   :  { %1974 = vmatmul.mubr.f32.gmra.mrb[52].mxu1 %v1653_v3 }
 0x198   :  { %1978 = vmatprep.mubr.f32.mxu1 %v1660_v30 }
 0x19b   :  { %1979 = vmatmul.mubr.f32.gmra.mrb[54].mxu1 %v1659_v22 }
 0x19c   :  { %1983 = vmatprep.mubr.f32.mxu1 %v1666_v24 }
 0x19f   :  { %1984 = vmatmul.mubr.f32.gmra.mrb[56].mxu1 %v1665_v12 }
 0x1a0   :  { %1988 = vmatprep.mubr.f32.mxu1 %v1672_v8 }
 0x1a3   :  { %1989 = vmatmul.mubr.f32.gmra.mrb[58].mxu1 %v1671_v49 }
 0x1a4   :  { %2636 = vmatprep.mubr.msk.f32.mxu1 %vm2807_vm2, %v2808_v45 }
 0x202   :  { %v2353_v23 = vpop.f32.mrb[24].mxu1 }
 0x203   :  { %v2354_v51 = vpop.f32.mrb[25].mxu1 }
 0x204   :  { %v2355_v32 = vadd.f32 %v2354_v51, %v2353_v23 }
 0x206   :  { %v2356_v37 = vpop.f32.mrb[26].mxu1  ;;  %v1776_v59 = vadd.f32 %v2355_v32, %v1682_v57 }
 0x207   :  { %v2357_v50 = vpop.f32.mrb[27].mxu1 }
 0x208   :  { %v2358_v61 = vadd.f32 %v2357_v50, %v2356_v37 }
 0x20a   :  { %v2359_v52 = vpop.f32.mrb[28].mxu1  ;;  %v1781_v15 = vadd.f32 %v2358_v61, %v1687_v54 }
 0x20b   :  { %v2360_v1 = vpop.f32.mrb[29].mxu1 }
 0x20c   :  { %v2361_v21 = vadd.f32 %v2360_v1, %v2359_v52 }
 0x20e   :  { %v2362_v39 = vpop.f32.mrb[30].mxu1  ;;  %v1786_v58 = vadd.f32 %v2361_v21, %v1692_v9 }
 0x20f   :  { %v2363_v46 = vpop.f32.mrb[31].mxu1 }
 0x210   :  { %v2364_v20 = vadd.f32 %v2363_v46, %v2362_v39 }
 0x212   :  { %v2365_v4 = vpop.f32.mrb[32].mxu1  ;;  %v1791_v56 = vadd.f32 %v2364_v20, %v1697_v38 }
 0x213   :  { %v2366_v7 = vpop.f32.mrb[33].mxu1 }
 0x214   :  { %v2367_v2 = vadd.f32 %v2366_v7, %v2365_v4 }
 0x216   :  { %v2368_v35 = vpop.f32.mrb[34].mxu1  ;;  %v1796_v11 = vadd.f32 %v2367_v2, %v1702_v19 }
 0x217   :  { %v2369_v29 = vpop.f32.mrb[35].mxu1 }
 0x218   :  { %v2370_v17 = vadd.f32 %v2369_v29, %v2368_v35 }
 0x21a   :  { %v1801_v13 = vadd.f32 %v2370_v17, %v1707_v31 }
 0x242   :  { %v2403_v63 = vpop.f32.mrb[36].mxu1 }
 0x243   :  { %v2404_v18 = vpop.f32.mrb[37].mxu1 }
 0x244   :  { %v2405_v53 = vadd.f32 %v2404_v18, %v2403_v63 }
 0x246   :  { %v1871_v47 = vadd.f32 %v2405_v53, %v1776_v59  ;;  %v2406_v6 = vpop.f32.mrb[38].mxu1 }
 0x247   :  { %v2407_v33 = vpop.f32.mrb[39].mxu1 }
 0x248   :  { %v2408_v40 = vadd.f32 %v2407_v33, %v2406_v6 }
 0x24a   :  { %v1876_v14 = vadd.f32 %v2408_v40, %v1781_v15  ;;  %v2409_v0 = vpop.f32.mrb[40].mxu1 }
 0x24b   :  { %v2410_v16 = vpop.f32.mrb[41].mxu1 }
 0x24c   :  { %v2411_v43 = vadd.f32 %v2410_v16, %v2409_v0 }
 0x24e   :  { %v1881_v48 = vadd.f32 %v2411_v43, %v1786_v58  ;;  %v2412_v44 = vpop.f32.mrb[42].mxu1 }
 0x24f   :  { %v2413_v62 = vpop.f32.mrb[43].mxu1 }
 0x250   :  { %v2414_v55 = vadd.f32 %v2413_v62, %v2412_v44  ;;  %v2026_v44 = vld [vmem:[%s4044_s5] sm:$0xf] }
 0x252   :  { %v1886_v41 = vadd.f32 %v2414_v55, %v1791_v56  ;;  %v2415_v5 = vpop.f32.mrb[44].mxu1 }
 0x253   :  { %v2416_v28 = vpop.f32.mrb[45].mxu1 }
 0x254   :  { %v2417_v34 = vadd.f32 %v2416_v28, %v2415_v5 }
 0x256   :  { %v1891_v27 = vadd.f32 %v2417_v34, %v1796_v11  ;;  %v2418_v26 = vpop.f32.mrb[46].mxu1 }
 0x257   :  { %v2419_v42 = vpop.f32.mrb[47].mxu1 }
 0x258   :  { %v2420_v60 = vadd.f32 %v2419_v42, %v2418_v26 }
 0x25a   :  { %v1896_v36 = vadd.f32 %v2420_v60, %v1801_v13 }
 0x262   :  { %v2453_v25 = vpop.f32.mrb[48].mxu1 }
 0x263   :  { %v2454_v3 = vpop.f32.mrb[49].mxu1 }
 0x264   :  { %v2455_v30 = vadd.f32 %v2454_v3, %v2453_v25 }
 0x266   :  { %v1966_v22 = vadd.f32 %v2455_v30, %v1871_v47  ;;  %v2456_v24 = vpop.f32.mrb[50].mxu1 }
 0x267   :  { %v2457_v12 = vpop.f32.mrb[51].mxu1 }
 0x268   :  { %v2458_v8 = vadd.f32 %v2457_v12, %v2456_v24  ;;  %v1994_v57 = vand.u32 2147483647, %v1966_v22 }
 0x26a   :  { %v1971_v49 = vadd.f32 %v2458_v8, %v1876_v14  ;;  %v2459_v23 = vpop.f32.mrb[52].mxu1  ;;  %v1996_v53 = vadd.f32 1e-10, %v1994_v57 }
 0x26b   :  { %v2460_v51 = vpop.f32.mrb[53].mxu1 }
 0x26c   :  { %v2461_v32 = vadd.f32 %v2460_v51, %v2459_v23  ;;  %v1995_v47 = vand.u32 2147483647, %v1971_v49 }
 0x26e   :  { %v1976_v37 = vadd.f32 %v2461_v32, %v1881_v48  ;;  %v2462_v50 = vpop.f32.mrb[54].mxu1  ;;  %v1997_v15 = vadd.f32 1e-10, %v1995_v47 }
 0x26f   :  { %v2463_v61 = vpop.f32.mrb[55].mxu1 }
 0x270   :  { %v2213_v52 = vmul.f32 -1.442695, %v1976_v37  ;;  %v2464_v1 = vadd.f32 %v2463_v61, %v2462_v50 }
 0x272   :  { %2765 = vpow2.f32 %v2213_v52  ;;  %v1981_v21 = vadd.f32 %v2464_v1, %v1886_v41  ;;  %v2465_v10 = vpop.f32.mrb[56].mxu1 }
 0x273   :  { %v2466_v39 = vpop.f32.mrb[57].mxu1 }
 0x274   :  { %v2214_v46 = vmul.f32 -1.442695, %v1981_v21  ;;  %v2467_v20 = vadd.f32 %v2466_v39, %v2465_v10 }
 0x276   :  { %2767 = vpow2.f32 %v2214_v46  ;;  %v1986_v4 = vadd.f32 %v2467_v20, %v1891_v27  ;;  %v2468_v7 = vpop.f32.mrb[58].mxu1 }
 0x277   :  { %v2469_v2 = vpop.f32.mrb[59].mxu1 }
 0x278   :  { %v2215_v35 = vmul.f32 -1.442695, %v1986_v4  ;;  %v2470_v29 = vadd.f32 %v2469_v2, %v2468_v7 }
 0x27a   :  { %2769 = vpow2.f32 %v2215_v35  ;;  %v1991_v17 = vadd.f32 %v2470_v29, %v1896_v36 }
 0x27c   :  { %v2766_v45 = vpop.eup %2765  ;;  %v2216_v9 = vmul.f32 -1.442695, %v1991_v17 }
 0x27d   :  { %v2004_v38 = vadd.f32 1.0, %v2766_v45 }
 0x27e   :  { %2771 = vpow2.f32 %v2216_v9 }
 0x27f   :  { %2773 = vrcp.f32 %v2004_v38 }
 0x280   :  { %v2768_v19 = vpop.eup %2767 }
 0x281   :  { %v2005_v31 = vadd.f32 1.0, %v2768_v19 }
 0x283   :  { %2775 = vrcp.f32 %v2005_v31 }
 0x284   :  { %v2770_v63 = vpop.eup %2769 }
 0x285   :  { %v2016_v18 = vadd.f32 1.0, %v2770_v63 }
 0x287   :  { %2777 = vrcp.f32 %v2016_v18 }
 0x288   :  { %v2772_v59 = vpop.eup %2771 }
 0x289   :  { %v2774_v6 = vpop.eup %2773  ;;  %v2017_v54 = vadd.f32 1.0, %v2772_v59 }
 0x28a   :  { %v2022_v33 = vmul.f32 %v2774_v6, %v1996_v53 }
 0x28b   :  { %2779 = vrcp.f32 %v2017_v54 }
 0x28d   :  { %v2776_v40 = vpop.eup %2775 }
 0x28e   :  { %v2023_v14 = vmul.f32 %v2776_v40, %v1997_v15 }
 0x291   :  { %v2778_v0 = vpop.eup %2777 }
 0x292   :  { %v2024_v16 = vmul.f32 %v2778_v0, %v2022_v33 }
 0x295   :  { %v2780_v58 = vpop.eup %2779 }
 0x296   :  { %v2025_v43 = vmul.f32 %v2780_v58, %v2023_v14 }
 0x298   :  { %v2748_v48 = vpack.c.bf16 %v2025_v43, %v2024_v16 }
 0x29a   :  { %2749 = vmatpush3.bf16.msra.mxu1 %v2748_v48 }
 0x29d   :  { %2637 = vmatmul.mubr.msk.f32.vlgmr.msra.gmra.mrb[60].mxu1 %vm2027_vm3, %v2026_v44 }
 0x370   :  { %v2097_v62 = vpop.f32.mrb[60].mxu1 }
 0x371   :  { %2101 = vst [vmem:[#allocation2] sm:$0xf] %v2097_v62  ;;  %v2638_v56 = vpop.f32.mrb[61].mxu1 }
 0x372   :  { %2792 = shalt.err (!%p2789_p4)
}
 0x373   :  { %s2793_s2 = scalar_lea.hbm %s4045_s6, 64 }
 0x374   :  { %p2794_p5 = scmp.ne.s32.totalorder %s4045_s6, %s2793_s2  ;;  %p2797_p6 = scmp.lt.u32.totalorder %s2793_s2, %s4045_s6 }
 0x376   :  { %p2799_p7 = pnand %p2797_p6, %p2794_p5 }
 0x378   :  { %2802 = shalt.err (!%p2799_p7)
}
 0x379   :  { %2111 = dma.vmem_to_hbm [thread:$0]  %s2109_s20, 64, %s4045_s6, [#allocation3]  }
 0x37a   :  { %2803 = dma.done.wait [#allocation3], 64  }
 0x37b   :  { %2804 = vsyncadd [#allocation3], 4294967232 }
 0x37c   :  { %2115 = vsyncpa [#allocation3], 1 }

</bundles_post_ra>
